<compile_context>
chip_gen: v7x
topology: tpu7x:2x2x1
jax: 0.10.0
libtpu: 0.0.40
codegen_flags: <defaults>
</compile_context>

<pallas_src>
import math
import functools

import jax
import jax.numpy as jnp
from jax.experimental import pallas as pl
from jax.experimental.pallas import tpu as pltpu


# Matmul operand dtype.  bf16 feeds the 2x256^2 MXU on v6e/v7x at full rate and
# halves operand bytes through VMEM/vregs; accumulation stays f32.  Set back to
# jnp.float32 only if bit-matching the f32 PyTorch reference is a hard requirement.
MXU_DTYPE = jnp.bfloat16

# Attention-probability output dtype.  The (B,H,Lq,Lk) prob tensor is the largest
# HBM write of the layer at real shapes; switch to jnp.bfloat16 to halve it (the
# reference forward returns it, so it cannot be dropped entirely).
PROB_DTYPE = jnp.float32

VMEM_LIMIT_BYTES = 64 * 1024 * 1024


def _rmsnorm(x, w, eps):
    # T5-style RMSNorm: no mean subtraction, no bias (f32 math on the VPU).
    var = jnp.mean(x * x, axis=-1, keepdims=True)
    return (x * jax.lax.rsqrt(var + eps)) * w


# ----------------------------------------------------------------------------
# Pallas kernels
# ----------------------------------------------------------------------------

def attn_kernel(*refs, eps, has_bias, norm_kv):
    """One (batch, q_block, head) step of T5 attention.

    Grid: (B, Lq/tq, H) with dims ("parallel", "parallel", "arbitrary").
    The output block (1, tq, D) ignores the head axis -> stays resident and
    accumulates the per-head output-projection partials.
    """
    if has_bias:
        (x_ref, kv_ref, nw_ref, bias_ref, mask_ref,
         wq_ref, wkv_ref, wo_ref, out_ref, prob_ref) = refs
    else:
        (x_ref, kv_ref, nw_ref, mask_ref,
         wq_ref, wkv_ref, wo_ref, out_ref, prob_ref) = refs
        bias_ref = None

    hd = pl.program_id(2)
    dh = wo_ref.shape[1]

    x = x_ref[0].astype(jnp.float32)                 # (tq, D) pre-norm input / residual
    xn = _rmsnorm(x, nw_ref[...], eps)               # fused T5LayerNorm (query side)
    kv_in = kv_ref[0].astype(jnp.float32)            # (Lk, D)
    kvn = _rmsnorm(kv_in, nw_ref[...], eps) if norm_kv else kv_in

    # Per-head projections against pre-reshaped (H, D, dh) / (H, D, 2dh) weights:
    # no activation transposes, K|V fused so the projection output is 2*dh lanes wide.
    q = jnp.dot(xn.astype(MXU_DTYPE), wq_ref[0],
                preferred_element_type=jnp.float32)                    # (tq, dh)
    kvp = jnp.dot(kvn.astype(MXU_DTYPE), wkv_ref[0],
                  preferred_element_type=jnp.float32)                  # (Lk, 2*dh)
    k = kvp[:, :dh]
    v = kvp[:, dh:]

    # NOTE: no 1/sqrt(d_head) scaling -- matches the PyTorch forward.
    scores = jnp.einsum('qd,kd->qk', q.astype(MXU_DTYPE), k.astype(MXU_DTYPE),
                        preferred_element_type=jnp.float32)            # (tq, Lk)
    scores = scores + mask_ref[0, 0]
    if has_bias:
        scores = scores + bias_ref[0]

    m = jnp.max(scores, axis=-1, keepdims=True)
    e = jnp.exp(scores - m)
    s = jnp.sum(e, axis=-1, keepdims=True)
    # Stored probs: exact division (matches reference softmax numerics).
    prob_ref[0, 0] = (e / s).astype(prob_ref.dtype)
    # Context path: approx reciprocal on the EUP slot (frees VALU).
    p = e * pl.reciprocal(s, approx=True)

    ctx = jnp.dot(p.astype(MXU_DTYPE), v.astype(MXU_DTYPE),
                  preferred_element_type=jnp.float32)                  # (tq, dh)
    partial = jnp.dot(ctx.astype(MXU_DTYPE), wo_ref[0],
                      preferred_element_type=jnp.float32)              # (tq, D)

    @pl.when(hd == 0)
    def _():
        out_ref[0] = x + partial                                        # residual added once

    @pl.when(hd > 0)
    def _():
        out_ref[0] = out_ref[0] + partial


def ffn_kernel(x_ref, nw_ref, w1_ref, w2_ref, o_ref, xn_ref, *, eps):
    """Grid: (rows/tm, F/tf) with dims ("parallel", "arbitrary").
    xn is computed once per row block (fj == 0) and cached in VMEM scratch."""
    fj = pl.program_id(1)

    @pl.when(fj == 0)
    def _():
        x = x_ref[...].astype(jnp.float32)
        xn_ref[...] = _rmsnorm(x, nw_ref[...], eps)   # fused T5LayerNorm

    h = jnp.dot(xn_ref[...].astype(MXU_DTYPE), w1_ref[...],
                preferred_element_type=jnp.float32)    # (tm, tf)
    h = jnp.maximum(h, 0.0)                            # ReLU; dropout is eval-identity
    partial = jnp.dot(h.astype(MXU_DTYPE), w2_ref[...],
                      preferred_element_type=jnp.float32)  # (tm, D)

    @pl.when(fj == 0)
    def _():
        o_ref[...] = x_ref[...].astype(jnp.float32) + partial

    @pl.when(fj > 0)
    def _():
        o_ref[...] = o_ref[...] + partial


# ----------------------------------------------------------------------------
# Wrappers
# ----------------------------------------------------------------------------

def _pick_tile(total, want):
    # Largest clean tile: the requested size if it divides, otherwise the full dim.
    if total <= want or total % want != 0:
        return total
    return want


def t5_attention(x, kv, norm_w, pos_bias, mask, wq, wk, wv, wo, num_heads, eps,
                 *, norm_kv, block_q=256, probs_dtype=PROB_DTYPE):
    b, lq, d = x.shape
    lk = kv.shape[1]
    h = num_heads
    dh = d // h
    tq = _pick_tile(lq, block_q)
    has_bias = pos_bias is not None

    # Trace-time weight relayout (one-off, free): (D, H*dh) -> (H, D, dh) etc. so the
    # per-head kernel never transposes activations; cast weights to bf16 for DMA.
    wq_r = jnp.transpose(wq.reshape(d, h, dh), (1, 0, 2)).astype(MXU_DTYPE)     # (H, D, dh)
    wk_r = jnp.transpose(wk.reshape(d, h, dh), (1, 0, 2))
    wv_r = jnp.transpose(wv.reshape(d, h, dh), (1, 0, 2))
    wkv_r = jnp.concatenate([wk_r, wv_r], axis=-1).astype(MXU_DTYPE)            # (H, D, 2dh)
    wo_r = wo.reshape(h, dh, d).astype(MXU_DTYPE)                               # (H, dh, D)

    in_specs = [
        pl.BlockSpec((1, tq, d), lambda bi, qi, hi: (bi, qi, 0)),      # q-side input / residual
        pl.BlockSpec((1, lk, d), lambda bi, qi, hi: (bi, 0, 0)),       # kv-side input
        pl.BlockSpec((1, d), lambda bi, qi, hi: (0, 0)),               # norm weight
    ]
    operands = [x, kv, norm_w.reshape(1, d)]
    if has_bias:
        in_specs.append(pl.BlockSpec((1, tq, lk), lambda bi, qi, hi: (hi, qi, 0)))
        operands.append(pos_bias)                                      # (H, Lq, Lk)
    in_specs += [
        pl.BlockSpec((1, 1, tq, lk), lambda bi, qi, hi: (bi, 0, qi, 0)),   # additive mask
        pl.BlockSpec((1, d, dh), lambda bi, qi, hi: (hi, 0, 0)),           # Wq (per head)
        pl.BlockSpec((1, d, 2 * dh), lambda bi, qi, hi: (hi, 0, 0)),       # Wk|Wv (per head)
        pl.BlockSpec((1, dh, d), lambda bi, qi, hi: (hi, 0, 0)),           # Wo (per head)
    ]
    operands += [mask, wq_r, wkv_r, wo_r]

    out, prob = pl.pallas_call(
        functools.partial(attn_kernel, eps=eps, has_bias=has_bias, norm_kv=norm_kv),
        grid=(b, lq // tq, h),
        in_specs=in_specs,
        out_specs=[
            pl.BlockSpec((1, tq, d), lambda bi, qi, hi: (bi, qi, 0)),      # head-accumulated
            pl.BlockSpec((1, 1, tq, lk), lambda bi, qi, hi: (bi, hi, qi, 0)),
        ],
        out_shape=[
            jax.ShapeDtypeStruct((b, lq, d), jnp.float32),
            jax.ShapeDtypeStruct((b, h, lq, lk), probs_dtype),
        ],
        compiler_params=pltpu.CompilerParams(
            dimension_semantics=("parallel", "parallel", "arbitrary"),
            vmem_limit_bytes=VMEM_LIMIT_BYTES),
    )(*operands)
    return out, prob


def t5_ffn(x, norm_w, w1, w2, eps, *, block_m=512, block_f=1024):
    b, l, d = x.shape
    f = w1.shape[1]
    n = b * l
    tm = _pick_tile(n, block_m)
    tf = _pick_tile(f, block_f)

    out = pl.pallas_call(
        functools.partial(ffn_kernel, eps=eps),
        grid=(n // tm, f // tf),
        in_specs=[
            pl.BlockSpec((tm, d), lambda i, j: (i, 0)),
            pl.BlockSpec((1, d), lambda i, j: (0, 0)),
            pl.BlockSpec((d, tf), lambda i, j: (0, j)),
            pl.BlockSpec((tf, d), lambda i, j: (j, 0)),
        ],
        out_specs=pl.BlockSpec((tm, d), lambda i, j: (i, 0)),
        out_shape=jax.ShapeDtypeStruct((n, d), jnp.float32),
        scratch_shapes=[pltpu.VMEM((tm, d), jnp.float32)],
        compiler_params=pltpu.CompilerParams(
            dimension_semantics=("parallel", "arbitrary"),
            vmem_limit_bytes=VMEM_LIMIT_BYTES),
    )(x.reshape(n, d), norm_w.reshape(1, d),
      w1.astype(MXU_DTYPE), w2.astype(MXU_DTYPE))
    return out.reshape(b, l, d)


# ----------------------------------------------------------------------------
# Relative position bias (plain-JAX glue; mirrors T5Attention._relative_position_bucket)
# ----------------------------------------------------------------------------

def _relative_position_bucket(relative_position, bidirectional, num_buckets=32,
                              max_distance=128):
    relative_buckets = jnp.zeros_like(relative_position)
    if bidirectional:
        num_buckets //= 2
        relative_buckets = relative_buckets + (relative_position > 0).astype(jnp.int32) * num_buckets
        relative_position = jnp.abs(relative_position)
    else:
        relative_position = -jnp.minimum(relative_position, jnp.zeros_like(relative_position))
    max_exact = num_buckets // 2
    is_small = relative_position < max_exact
    # Clamp before log: avoids log(0) -> -inf feeding the (unselected) int cast.
    safe_rel = jnp.maximum(relative_position, 1)
    rel_if_large = max_exact + (
        jnp.log(safe_rel.astype(jnp.float32) / max_exact)
        / math.log(max_distance / max_exact) * (num_buckets - max_exact)
    ).astype(jnp.int32)
    rel_if_large = jnp.minimum(rel_if_large, jnp.full_like(rel_if_large, num_buckets - 1))
    relative_buckets = relative_buckets + jnp.where(is_small, relative_position, rel_if_large)
    return relative_buckets


def compute_bias(query_length, key_length, rel_emb, bidirectional, num_buckets):
    context_position = jnp.arange(query_length, dtype=jnp.int32)[:, None]
    memory_position = jnp.arange(key_length, dtype=jnp.int32)[None, :]
    relative_position = memory_position - context_position
    bucket = _relative_position_bucket(relative_position, bidirectional, num_buckets)
    values = rel_emb[bucket]                              # (Lq, Lk, H)
    return jnp.transpose(values, (2, 0, 1))               # (H, Lq, Lk), batch-invariant


# ----------------------------------------------------------------------------
# Full decoder layer
# ----------------------------------------------------------------------------

def t5_decoder_layer(inputs, self_attention_mask, enc_outputs, cross_attention_mask,
                     params, num_heads, num_buckets, eps=1e-6, probs_dtype=PROB_DTYPE):
    b, lq, d = inputs.shape

    # self-attention relative position bias (batch-invariant (H,Lq,Lq))
    self_pos_bias = compute_bias(lq, lq, params["rel_bias"], bidirectional=False,
                                 num_buckets=num_buckets)

    # --- self attention (RMSNorm on Q and K/V fused inside the kernel) ---
    sa_out, self_attn_prob = t5_attention(
        inputs, inputs, params["sa_norm_w"], self_pos_bias, self_attention_mask,
        params["sa_wq"], params["sa_wk"], params["sa_wv"], params["sa_wo"],
        num_heads, eps, norm_kv=True, probs_dtype=probs_dtype)

    # --- cross attention (RMSNorm on query only; no relative bias, no zero-bias DMA) ---
    ca_out, cross_attn_prob = t5_attention(
        sa_out, enc_outputs, params["ca_norm_w"], None, cross_attention_mask,
        params["ca_wq"], params["ca_wk"], params["ca_wv"], params["ca_wo"],
        num_heads, eps, norm_kv=False, probs_dtype=probs_dtype)

    # --- feed forward (RMSNorm fused, F-reduction tiled) ---
    out = t5_ffn(ca_out, params["ff_norm_w"], params["ff_w1"], params["ff_w2"], eps)

    return out, self_attn_prob, cross_attn_prob


# ----------------------------------------------------------------------------
# Main
# ----------------------------------------------------------------------------

if __name__ == "__main__":
    # config
    B = 2
    DEC_SEQ = 8
    ENC_SEQ = 8
    D_MODEL = 32
    N_HEADS = 4
    FF_DIM = 64
    NUM_BUCKETS = 32
    EPS = 1e-6

    key = jax.random.PRNGKey(0)
    keys = jax.random.split(key, 16)

    def w(k, shape, scale=0.02):
        return (scale * jax.random.normal(k, shape)).astype(jnp.float32)

    params = {
        "sa_norm_w": jnp.ones((D_MODEL,), jnp.float32),
        "ca_norm_w": jnp.ones((D_MODEL,), jnp.float32),
        "ff_norm_w": jnp.ones((D_MODEL,), jnp.float32),
        "sa_wq": w(keys[0], (D_MODEL, D_MODEL)),
        "sa_wk": w(keys[1], (D_MODEL, D_MODEL)),
        "sa_wv": w(keys[2], (D_MODEL, D_MODEL)),
        "sa_wo": w(keys[3], (D_MODEL, D_MODEL)),
        "ca_wq": w(keys[4], (D_MODEL, D_MODEL)),
        "ca_wk": w(keys[5], (D_MODEL, D_MODEL)),
        "ca_wv": w(keys[6], (D_MODEL, D_MODEL)),
        "ca_wo": w(keys[7], (D_MODEL, D_MODEL)),
        "ff_w1": w(keys[8], (D_MODEL, FF_DIM)),
        "ff_w2": w(keys[9], (FF_DIM, D_MODEL)),
        "rel_bias": w(keys[10], (NUM_BUCKETS, N_HEADS)),  # nn.Embedding(num_buckets, heads)
    }

    inputs = jax.random.normal(keys[11], (B, DEC_SEQ, D_MODEL), dtype=jnp.float32)
    enc_outputs = jax.random.normal(keys[12], (B, ENC_SEQ, D_MODEL), dtype=jnp.float32)

    # causal self-attention mask: 0 where allowed, -1e9 where masked (additive)
    causal = jnp.tril(jnp.ones((DEC_SEQ, DEC_SEQ), dtype=bool))
    self_attention_mask = jnp.where(causal, 0.0, -1e9).astype(jnp.float32)
    self_attention_mask = jnp.broadcast_to(self_attention_mask[None, None],
                                           (B, 1, DEC_SEQ, DEC_SEQ))
    # cross-attention mask: all positions visible
    cross_attention_mask = jnp.zeros((B, 1, DEC_SEQ, ENC_SEQ), dtype=jnp.float32)

    out, self_prob, cross_prob = t5_decoder_layer(
        inputs, self_attention_mask, enc_outputs, cross_attention_mask,
        params, num_heads=N_HEADS, num_buckets=NUM_BUCKETS, eps=EPS)

    jax.block_until_ready((out, self_prob, cross_prob))

    assert out.shape == (B, DEC_SEQ, D_MODEL)
    assert self_prob.shape == (B, N_HEADS, DEC_SEQ, DEC_SEQ)
    assert cross_prob.shape == (B, N_HEADS, DEC_SEQ, ENC_SEQ)
    assert bool(jnp.all(jnp.isfinite(out)))
    # softmax rows (exact-division path) must sum to ~1
    assert bool(jnp.allclose(self_prob.astype(jnp.float32).sum(-1), 1.0, atol=1e-3))
    assert bool(jnp.allclose(cross_prob.astype(jnp.float32).sum(-1), 1.0, atol=1e-3))
    print("KERNEL_OK")
</pallas_src>

<mosaic_0001>
module attributes {stable_mosaic.version = 11 : i64} {
  func.func @attn_kernel(%arg0: i32, %arg1: i32, %arg2: i32, %arg3: memref<1x8x32xf32, #tpu.memory_space<vmem>>, %arg4: memref<1x8x32xf32, #tpu.memory_space<vmem>>, %arg5: memref<1x32xf32, #tpu.memory_space<vmem>>, %arg6: memref<1x8x8xf32, #tpu.memory_space<vmem>>, %arg7: memref<1x1x8x8xf32, #tpu.memory_space<vmem>>, %arg8: memref<1x32x8xbf16, #tpu.memory_space<vmem>>, %arg9: memref<1x32x16xbf16, #tpu.memory_space<vmem>>, %arg10: memref<1x8x32xbf16, #tpu.memory_space<vmem>>, %arg11: memref<1x8x32xf32, #tpu.memory_space<vmem>>, %arg12: memref<1x1x8x8xf32, #tpu.memory_space<vmem>>) attributes {dimension_semantics = [#tpu.dimension_semantics<parallel>, #tpu.dimension_semantics<parallel>, #tpu.dimension_semantics<arbitrary>], iteration_bounds = array<i64: 2, 1, 4>, scalar_prefetch = 0 : i64, scratch_operands = 0 : i64, tpu.core_type = #tpu.core_type<tc>, window_params = [{transform_indices = @transform_0, window_bounds = array<i64: 1, 8, 32>}, {transform_indices = @transform_1, window_bounds = array<i64: 1, 8, 32>}, {pipeline_mode = #tpu.pipeline_mode<synchronous>, transform_indices = @transform_2, window_bounds = array<i64: 1, 32>}, {transform_indices = @transform_3, window_bounds = array<i64: 1, 8, 8>}, {transform_indices = @transform_4, window_bounds = array<i64: 1, 1, 8, 8>}, {transform_indices = @transform_5, window_bounds = array<i64: 1, 32, 8>}, {transform_indices = @transform_6, window_bounds = array<i64: 1, 32, 16>}, {transform_indices = @transform_7, window_bounds = array<i64: 1, 8, 32>}, {transform_indices = @transform_8, window_bounds = array<i64: 1, 8, 32>}, {transform_indices = @transform_9, window_bounds = array<i64: 1, 1, 8, 8>}]} {
    %c0 = arith.constant 0 : index
    %c0_0 = arith.constant 0 : index
    %c0_1 = arith.constant 0 : index
    %0 = vector.load %arg3[%c0, %c0_0, %c0_1] : memref<1x8x32xf32, #tpu.memory_space<vmem>>, vector<1x8x32xf32>
    %1 = vector.shape_cast %0 : vector<1x8x32xf32> to vector<8x32xf32>
    %c0_2 = arith.constant 0 : index
    %c0_3 = arith.constant 0 : index
    %2 = vector.load %arg5[%c0_2, %c0_3] : memref<1x32xf32, #tpu.memory_space<vmem>>, vector<1x32xf32>
    %3 = arith.mulf %1, %1 : vector<8x32xf32>
    %cst = arith.constant dense<0.000000e+00> : vector<8xf32>
    %4 = vector.multi_reduction <add>, %3, %cst [1] : vector<8x32xf32> to vector<8xf32>
    %5 = vector.shape_cast %4 : vector<8xf32> to vector<8x1xf32>
    %cst_4 = arith.constant 3.200000e+01 : f32
    %6 = vector.broadcast %cst_4 : f32 to vector<8x1xf32>
    %7 = arith.divf %5, %6 : vector<8x1xf32>
    %cst_5 = arith.constant 9.99999997E-7 : f32
    %8 = vector.broadcast %cst_5 : f32 to vector<8x1xf32>
    %9 = arith.addf %7, %8 : vector<8x1xf32>
    %10 = math.rsqrt %9 : vector<8x1xf32>
    %11 = vector.broadcast %10 : vector<8x1xf32> to vector<8x32xf32>
    %12 = arith.mulf %1, %11 : vector<8x32xf32>
    %13 = vector.broadcast %2 : vector<1x32xf32> to vector<8x32xf32>
    %14 = arith.mulf %12, %13 : vector<8x32xf32>
    %c0_6 = arith.constant 0 : index
    %c0_7 = arith.constant 0 : index
    %c0_8 = arith.constant 0 : index
    %15 = vector.load %arg4[%c0_6, %c0_7, %c0_8] : memref<1x8x32xf32, #tpu.memory_space<vmem>>, vector<1x8x32xf32>
    %16 = vector.shape_cast %15 : vector<1x8x32xf32> to vector<8x32xf32>
    %c0_9 = arith.constant 0 : index
    %c0_10 = arith.constant 0 : index
    %17 = vector.load %arg5[%c0_9, %c0_10] : memref<1x32xf32, #tpu.memory_space<vmem>>, vector<1x32xf32>
    %18 = arith.mulf %16, %16 : vector<8x32xf32>
    %cst_11 = arith.constant dense<0.000000e+00> : vector<8xf32>
    %19 = vector.multi_reduction <add>, %18, %cst_11 [1] : vector<8x32xf32> to vector<8xf32>
    %20 = vector.shape_cast %19 : vector<8xf32> to vector<8x1xf32>
    %cst_12 = arith.constant 3.200000e+01 : f32
    %21 = vector.broadcast %cst_12 : f32 to vector<8x1xf32>
    %22 = arith.divf %20, %21 : vector<8x1xf32>
    %cst_13 = arith.constant 9.99999997E-7 : f32
    %23 = vector.broadcast %cst_13 : f32 to vector<8x1xf32>
    %24 = arith.addf %22, %23 : vector<8x1xf32>
    %25 = math.rsqrt %24 : vector<8x1xf32>
    %26 = vector.broadcast %25 : vector<8x1xf32> to vector<8x32xf32>
    %27 = arith.mulf %16, %26 : vector<8x32xf32>
    %28 = vector.broadcast %17 : vector<1x32xf32> to vector<8x32xf32>
    %29 = arith.mulf %27, %28 : vector<8x32xf32>
    %30 = arith.truncf %14 : vector<8x32xf32> to vector<8x32xbf16>
    %c0_14 = arith.constant 0 : index
    %c0_15 = arith.constant 0 : index
    %c0_16 = arith.constant 0 : index
    %31 = vector.load %arg8[%c0_14, %c0_15, %c0_16] : memref<1x32x8xbf16, #tpu.memory_space<vmem>>, vector<1x32x8xbf16>
    %32 = vector.shape_cast %31 : vector<1x32x8xbf16> to vector<32x8xbf16>
    %cst_17 = arith.constant dense<0.000000e+00> : vector<8x8xf32>
    %33 = tpu.matmul %30, %32, %cst_17 {dimension_numbers = #tpu.dot_dimension_numbers<[1], [0], [0], [1], [0, 0, 1, 1], [], []>} : vector<8x32xbf16>, vector<32x8xbf16>, vector<8x8xf32> -> vector<8x8xf32>
    %34 = arith.truncf %29 : vector<8x32xf32> to vector<8x32xbf16>
    %c0_18 = arith.constant 0 : index
    %c0_19 = arith.constant 0 : index
    %c0_20 = arith.constant 0 : index
    %35 = vector.load %arg9[%c0_18, %c0_19, %c0_20] : memref<1x32x16xbf16, #tpu.memory_space<vmem>>, vector<1x32x16xbf16>
    %36 = vector.shape_cast %35 : vector<1x32x16xbf16> to vector<32x16xbf16>
    %cst_21 = arith.constant dense<0.000000e+00> : vector<8x16xf32>
    %37 = tpu.matmul %34, %36, %cst_21 {dimension_numbers = #tpu.dot_dimension_numbers<[1], [0], [0], [1], [0, 0, 1, 1], [], []>} : vector<8x32xbf16>, vector<32x16xbf16>, vector<8x16xf32> -> vector<8x16xf32>
    %38 = vector.extract_strided_slice %37 {offsets = [0, 0], sizes = [8, 8], strides = [1, 1]} : vector<8x16xf32> to vector<8x8xf32>
    %39 = vector.extract_strided_slice %37 {offsets = [0, 8], sizes = [8, 8], strides = [1, 1]} : vector<8x16xf32> to vector<8x8xf32>
    %40 = arith.truncf %33 : vector<8x8xf32> to vector<8x8xbf16>
    %41 = arith.truncf %38 : vector<8x8xf32> to vector<8x8xbf16>
    "tpu.trace_start"() <{level = 10 : i32, message = "qd,kd->qk"}> : () -> ()
    %cst_22 = arith.constant dense<0.000000e+00> : vector<8x8xf32>
    %42 = tpu.matmul %40, %41, %cst_22 {dimension_numbers = #tpu.dot_dimension_numbers<[1], [1], [0], [0], [0, 0, 1, 0], [], []>} : vector<8x8xbf16>, vector<8x8xbf16>, vector<8x8xf32> -> vector<8x8xf32>
    "tpu.trace_stop"() : () -> ()
    %c0_23 = arith.constant 0 : index
    %c0_24 = arith.constant 0 : index
    %c0_25 = arith.constant 0 : index
    %c0_26 = arith.constant 0 : index
    %43 = vector.load %arg7[%c0_23, %c0_24, %c0_25, %c0_26] : memref<1x1x8x8xf32, #tpu.memory_space<vmem>>, vector<1x1x8x8xf32>
    %44 = vector.shape_cast %43 : vector<1x1x8x8xf32> to vector<8x8xf32>
    %45 = arith.addf %42, %44 : vector<8x8xf32>
    %c0_27 = arith.constant 0 : index
    %c0_28 = arith.constant 0 : index
    %c0_29 = arith.constant 0 : index
    %46 = vector.load %arg6[%c0_27, %c0_28, %c0_29] : memref<1x8x8xf32, #tpu.memory_space<vmem>>, vector<1x8x8xf32>
    %47 = vector.shape_cast %46 : vector<1x8x8xf32> to vector<8x8xf32>
    %48 = arith.addf %45, %47 : vector<8x8xf32>
    %cst_30 = arith.constant dense<0xFF800000> : vector<8xf32>
    %49 = vector.multi_reduction <maximumf>, %48, %cst_30 [1] : vector<8x8xf32> to vector<8xf32>
    %50 = vector.shape_cast %49 : vector<8xf32> to vector<8x1xf32>
    %51 = vector.broadcast %50 : vector<8x1xf32> to vector<8x8xf32>
    %52 = arith.subf %48, %51 : vector<8x8xf32>
    %53 = math.exp %52 : vector<8x8xf32>
    %cst_31 = arith.constant dense<0.000000e+00> : vector<8xf32>
    %54 = vector.multi_reduction <add>, %53, %cst_31 [1] : vector<8x8xf32> to vector<8xf32>
    %55 = vector.shape_cast %54 : vector<8xf32> to vector<8x1xf32>
    %56 = vector.broadcast %55 : vector<8x1xf32> to vector<8x8xf32>
    %57 = arith.divf %53, %56 : vector<8x8xf32>
    %c0_32 = arith.constant 0 : index
    %c0_33 = arith.constant 0 : index
    %c0_34 = arith.constant 0 : index
    %c0_35 = arith.constant 0 : index
    %58 = vector.load %arg12[%c0_32, %c0_33, %c0_34, %c0_35] : memref<1x1x8x8xf32, #tpu.memory_space<vmem>>, vector<1x1x8x8xf32>
    %59 = vector.shape_cast %58 : vector<1x1x8x8xf32> to vector<8x8xf32>
    %60 = vector.shape_cast %57 : vector<8x8xf32> to vector<1x1x8x8xf32>
    tpu.vector_store %arg12[%c0_32, %c0_33, %c0_34, %c0_35], %60 {strides = array<i32>} : memref<1x1x8x8xf32, #tpu.memory_space<vmem>>, vector<1x1x8x8xf32>,
    %61 = tpu.reciprocal %55 {approx = true} : vector<8x1xf32> -> vector<8x1xf32>
    %62 = vector.broadcast %61 : vector<8x1xf32> to vector<8x8xf32>
    %63 = arith.mulf %53, %62 : vector<8x8xf32>
    %64 = arith.truncf %63 : vector<8x8xf32> to vector<8x8xbf16>
    %65 = arith.truncf %39 : vector<8x8xf32> to vector<8x8xbf16>
    %cst_36 = arith.constant dense<0.000000e+00> : vector<8x8xf32>
    %66 = tpu.matmul %64, %65, %cst_36 {dimension_numbers = #tpu.dot_dimension_numbers<[1], [0], [0], [1], [0, 0, 1, 1], [], []>} : vector<8x8xbf16>, vector<8x8xbf16>, vector<8x8xf32> -> vector<8x8xf32>
    %67 = arith.truncf %66 : vector<8x8xf32> to vector<8x8xbf16>
    %c0_37 = arith.constant 0 : index
    %c0_38 = arith.constant 0 : index
    %c0_39 = arith.constant 0 : index
    %68 = vector.load %arg10[%c0_37, %c0_38, %c0_39] : memref<1x8x32xbf16, #tpu.memory_space<vmem>>, vector<1x8x32xbf16>
    %69 = vector.shape_cast %68 : vector<1x8x32xbf16> to vector<8x32xbf16>
    %cst_40 = arith.constant dense<0.000000e+00> : vector<8x32xf32>
    %70 = tpu.matmul %67, %69, %cst_40 {dimension_numbers = #tpu.dot_dimension_numbers<[1], [0], [0], [1], [0, 0, 1, 1], [], []>} : vector<8x8xbf16>, vector<8x32xbf16>, vector<8x32xf32> -> vector<8x32xf32>
    %c0_i32 = arith.constant 0 : i32
    %71 = arith.cmpi eq, %arg2, %c0_i32 : i32
    %72 = arith.extui %71 : i1 to i32
    %c0_i32_41 = arith.constant 0 : i32
    %73 = arith.cmpi ne, %72, %c0_i32_41 : i32
    scf.if %73 {
      %77 = arith.addf %1, %70 : vector<8x32xf32>
      %c0_44 = arith.constant 0 : index
      %c0_45 = arith.constant 0 : index
      %c0_46 = arith.constant 0 : index
      %78 = vector.load %arg11[%c0_44, %c0_45, %c0_46] : memref<1x8x32xf32, #tpu.memory_space<vmem>>, vector<1x8x32xf32>
      %79 = vector.shape_cast %78 : vector<1x8x32xf32> to vector<8x32xf32>
      %80 = vector.shape_cast %77 : vector<8x32xf32> to vector<1x8x32xf32>
      tpu.vector_store %arg11[%c0_44, %c0_45, %c0_46], %80 {strides = array<i32>} : memref<1x8x32xf32, #tpu.memory_space<vmem>>, vector<1x8x32xf32>,
    } else {
    }
    %c0_i32_42 = arith.constant 0 : i32
    %74 = arith.cmpi sgt, %arg2, %c0_i32_42 : i32
    %75 = arith.extui %74 : i1 to i32
    %c0_i32_43 = arith.constant 0 : i32
    %76 = arith.cmpi ne, %75, %c0_i32_43 : i32
    scf.if %76 {
      %c0_44 = arith.constant 0 : index
      %c0_45 = arith.constant 0 : index
      %c0_46 = arith.constant 0 : index
      %77 = vector.load %arg11[%c0_44, %c0_45, %c0_46] : memref<1x8x32xf32, #tpu.memory_space<vmem>>, vector<1x8x32xf32>
      %78 = vector.shape_cast %77 : vector<1x8x32xf32> to vector<8x32xf32>
      %79 = arith.addf %78, %70 : vector<8x32xf32>
      %c0_47 = arith.constant 0 : index
      %c0_48 = arith.constant 0 : index
      %c0_49 = arith.constant 0 : index
      %80 = vector.load %arg11[%c0_47, %c0_48, %c0_49] : memref<1x8x32xf32, #tpu.memory_space<vmem>>, vector<1x8x32xf32>
      %81 = vector.shape_cast %80 : vector<1x8x32xf32> to vector<8x32xf32>
      %82 = vector.shape_cast %79 : vector<8x32xf32> to vector<1x8x32xf32>
      tpu.vector_store %arg11[%c0_47, %c0_48, %c0_49], %82 {strides = array<i32>} : memref<1x8x32xf32, #tpu.memory_space<vmem>>, vector<1x8x32xf32>,
    } else {
    }
    return
  }
  func.func @transform_0(%arg0: i32, %arg1: i32, %arg2: i32) -> (i32, i32, i32) {
    %c0_i32 = arith.constant 0 : i32
    %c0_i32_0 = arith.constant 0 : i32
    return %arg0, %arg1, %c0_i32 : i32, i32, i32
  }
  func.func @transform_1(%arg0: i32, %arg1: i32, %arg2: i32) -> (i32, i32, i32) {
    %c0_i32 = arith.constant 0 : i32
    %c0_i32_0 = arith.constant 0 : i32
    %c0_i32_1 = arith.constant 0 : i32
    return %arg0, %c0_i32, %c0_i32_0 : i32, i32, i32
  }
  func.func @transform_2(%arg0: i32, %arg1: i32, %arg2: i32) -> (i32, i32) {
    %c0_i32 = arith.constant 0 : i32
    %c0_i32_0 = arith.constant 0 : i32
    %c0_i32_1 = arith.constant 0 : i32
    return %c0_i32, %c0_i32_0 : i32, i32
  }
  func.func @transform_3(%arg0: i32, %arg1: i32, %arg2: i32) -> (i32, i32, i32) {
    %c0_i32 = arith.constant 0 : i32
    %c0_i32_0 = arith.constant 0 : i32
    return %arg2, %arg1, %c0_i32 : i32, i32, i32
  }
  func.func @transform_4(%arg0: i32, %arg1: i32, %arg2: i32) -> (i32, i32, i32, i32) {
    %c0_i32 = arith.constant 0 : i32
    %c0_i32_0 = arith.constant 0 : i32
    %c0_i32_1 = arith.constant 0 : i32
    return %arg0, %c0_i32, %arg1, %c0_i32_0 : i32, i32, i32, i32
  }
  func.func @transform_5(%arg0: i32, %arg1: i32, %arg2: i32) -> (i32, i32, i32) {
    %c0_i32 = arith.constant 0 : i32
    %c0_i32_0 = arith.constant 0 : i32
    %c0_i32_1 = arith.constant 0 : i32
    return %arg2, %c0_i32, %c0_i32_0 : i32, i32, i32
  }
  func.func @transform_6(%arg0: i32, %arg1: i32, %arg2: i32) -> (i32, i32, i32) {
    %c0_i32 = arith.constant 0 : i32
    %c0_i32_0 = arith.constant 0 : i32
    %c0_i32_1 = arith.constant 0 : i32
    return %arg2, %c0_i32, %c0_i32_0 : i32, i32, i32
  }
  func.func @transform_7(%arg0: i32, %arg1: i32, %arg2: i32) -> (i32, i32, i32) {
    %c0_i32 = arith.constant 0 : i32
    %c0_i32_0 = arith.constant 0 : i32
    %c0_i32_1 = arith.constant 0 : i32
    return %arg2, %c0_i32, %c0_i32_0 : i32, i32, i32
  }
  func.func @transform_8(%arg0: i32, %arg1: i32, %arg2: i32) -> (i32, i32, i32) {
    %c0_i32 = arith.constant 0 : i32
    %c0_i32_0 = arith.constant 0 : i32
    return %arg0, %arg1, %c0_i32 : i32, i32, i32
  }
  func.func @transform_9(%arg0: i32, %arg1: i32, %arg2: i32) -> (i32, i32, i32, i32) {
    %c0_i32 = arith.constant 0 : i32
    %c0_i32_0 = arith.constant 0 : i32
    return %arg0, %arg2, %arg1, %c0_i32 : i32, i32, i32, i32
  }
}

</mosaic_0001>

<bundles_post_ra>
// kernel: tpu_custom_call.1
= control target key start
LH: loop header
LB: loop body
LE: loop exit
PB: predicated region body
PF: predicated region fallthrough
CT: control target
= control target key end

     0   :  { %s2701_s0 = inlined_call_operand.hbm [shape: f32[2,8,32], index: 0, kind: input, shape index: {}]   ;;  %s2702_s1 = inlined_call_operand.hbm [shape: f32[2,8,32], index: 1, kind: input, shape index: {}]   ;;  %s2703_s2 = inlined_call_operand.hbm [shape: f32[1,32], index: 2, kind: input, shape index: {}]   ;;  %s2704_s3 = inlined_call_operand.hbm [shape: f32[4,8,8], index: 3, kind: input, shape index: {}]   ;;  %s2705_s4 = inlined_call_operand.hbm [shape: f32[2,1,8,8], index: 4, kind: input, shape index: {}]   ;;  %s2706_s5 = inlined_call_operand.hbm [shape: bf16[4,32,8], index: 5, kind: input, shape index: {}]   ;;  %s2707_s6 = inlined_call_operand.hbm [shape: bf16[4,32,16], index: 6, kind: input, shape index: {}]   ;;  %s2708_s7 = inlined_call_operand.hbm [shape: bf16[4,8,32], index: 7, kind: input, shape index: {}]   ;;  %s2709_s8 = inlined_call_operand.hbm [shape: f32[2,8,32], index: 8, kind: output, shape index: {0}]   ;;  %s2710_s9 = inlined_call_operand.hbm [shape: f32[2,4,8,8], index: 9, kind: output, shape index: {1}]  }
   0x1   :  { %2759 = sst [smem:[#allocation50_spill]] %s2701_s0 }
   0x2   :  { %2760 = sst [smem:[#allocation51_spill]] %s2703_s2 }
   0x3   :  { %2761 = sst [smem:[#allocation52_spill]] %s2704_s3 }
   0x4   :  { %2762 = sst [smem:[#allocation53_spill]] %s2706_s5 }
   0x5   :  { %2763 = sst [smem:[#allocation54_spill]] %s2708_s7 }
   0x6   :  { %2764 = sst [smem:[#allocation55_spill]] %s2709_s8 }
   0x7   :  { %2765 = sst [smem:[#allocation56_spill]] %s2710_s9 }
   0x8   :  { %15 = vsyncpa [#allocation3], 0 }
   0x9   :  { %17 = vsyncpa [#allocation3 + $0x1], 0 }
   0xa   :  { %18 = vsyncpa [#allocation6], 0 }
   0xb   :  { %20 = vsyncpa [#allocation6 + $0x1], 0 }
   0xc   :  { %21 = vsyncpa [#allocation9], 0 }
   0xd   :  { %23 = vsyncpa [#allocation9 + $0x1], 0 }
   0xe   :  { %24 = vsyncpa [#allocation12], 0 }
   0xf   :  { %26 = vsyncpa [#allocation12 + $0x1], 0 }
  0x10   :  { %27 = vsyncpa [#allocation15], 0 }
  0x11   :  { %29 = vsyncpa [#allocation15 + $0x1], 0 }
  0x12   :  { %30 = vsyncpa [#allocation4], 0 }
  0x13   :  { %32 = vsyncpa [#allocation4 + $0x1], 0 }
  0x14   :  { %33 = vsyncpa [#allocation18], 0 }
  0x15   :  { %35 = vsyncpa [#allocation18 + $0x1], 0  ;;  %s2050_s30 = smov 0   ;;  %s2052_s10 = smov 0  }
  0x16   :  { %s2054_s11 = smov 0   ;;  %s2056_s12 = smov 0  }
  0x17   :  { %s2058_s13 = smov 0   ;;  %s2060_s14 = smov 0  }
  0x18   :  { %s2062_s15 = smov 0   ;;  %s2064_s16 = smov 0  }
  0x19   :  { %s2066_s17 = smov 0   ;;  %s2068_s18 = smov 0  }
  0x1a   :  { %s2070_s19 = smov 0   ;;  %s2072_s20 = smov 0  }
  0x1b   :  { %s2074_s21 = smov 0   ;;  %s2076_s22 = smov 0  }
  0x1c LB: > { %2766 = sst [smem:[#allocation28_spill]] %s1931_s30  ;;  %s2119_s23 = sadd.s32 4294967295, %s1983_s22   ;;  %s1983_s22 = sphi %s2076_s22, %s41_s22   ;;  %s1979_s21 = sphi %s2074_s21, %s2875_s21   ;;  %s1975_s20 = sphi %s2072_s20, %s2874_s20   ;;  %s1971_s19 = sphi %s2070_s19, %s2873_s19   ;;  %s1967_s18 = sphi %s2068_s18, %s2872_s18   ;;  %s1963_s17 = sphi %s2066_s17, %s2871_s17   ;;  %s1959_s16 = sphi %s2064_s16, %s2860_s16   ;;  %s1955_s15 = sphi %s2062_s15, %s2870_s15   ;;  %s1951_s14 = sphi %s2060_s14, %s2869_s14   ;;  %s1947_s13 = sphi %s2058_s13, %s2868_s13   ;;  %s1943_s12 = sphi %s2056_s12, %s2857_s12   ;;  %s1939_s11 = sphi %s2054_s11, %s2867_s11   ;;  %s1935_s10 = sphi %s2052_s10, %s2866_s10   ;;  %s1931_s30 = sphi %s2050_s30, %s2856_s30  }
  0x1d   : > { %2767 = sst [smem:[#allocation29_spill]] %s1935_s10  ;;  %s1256_s24 = sadd.s32 4294967294, %s1983_s22  }
  0x1e   : > { %2768 = sst [smem:[#allocation30_spill]] %s1947_s13  ;;  %p82_p0 = scmp.ne.s32.totalorder %s1959_s16, %s1955_s15 }
  0x1f   : > { %2769 = sst [smem:[#allocation31_spill]] %s1955_s15  ;;  %p2722_p1 = scmp.eq.s32.totalorder %s2119_s23, 0 }
  0x20   : > { %2770 = sst [smem:[#allocation32_spill]] %s1959_s16  ;;  %p157_p2 = scmp.ne.s32.totalorder %s1947_s13, %s1943_s12 }
  0x21   : > { %2771 = sst [smem:[#allocation33_spill]] %s1963_s17  ;;  %p2723_p3 = scmp.eq.s32.totalorder %s2119_s23, 7 }
  0x22   : > { %2772 = sst [smem:[#allocation34_spill]] %s1967_s18  ;;  %p2129_p4 = por %p2722_p1, %p82_p0 }
  0x23   : > { %2773 = sst [smem:[#allocation35_spill]] %s1971_s19  ;;  %p295_p5 = scmp.eq.s32.totalorder %s1256_s24, 7 }
  0x24   : > { %2774 = sst [smem:[#allocation36_spill]] %s1979_s21  ;;  %p2135_p6 = por %p157_p2, %p2722_p1 }
  0x25   : > { %2775 = sst [smem:[#allocation37_spill]] %s2119_s23  ;;  %p2140_p7 = por %p295_p5, %p82_p0 }
  0x26   : > { %s2776_s25 = scalar_select %p2129_p4, 1, 0 }
  0x27   : > { %s2778_s26 = scalar_select %p2135_p6, 1, 0 }
  0x28   : > { %2777 = sst [smem:[#allocation38_spill]] %s2776_s25  ;;  %p318_p8 = scmp.ne.s32.totalorder %s1939_s11, %s1935_s10 }
  0x29   : > { %2779 = sst [smem:[#allocation39_spill]] %s2778_s26  ;;  %p324_p9 = scmp.ne.s32.totalorder %s1935_s10, %s1931_s30 }
  0x2a   : > { %s2780_s28 = scalar_select %p2140_p7, 1, 0 }
  0x2b   : > { %p1257_p10 = scmp.ge.s32.totalorder %s1983_s22, 1  ;;  %p2151_p11 = por %p318_p8, %p2723_p3 }
  0x2c   : > { %2781 = sst [smem:[#allocation40_spill]] %s2780_s28  ;;  %p332_p12 = scmp.lt.s32.totalorder %s1983_s22, 9 }
  0x2d   : > { %s2782_s29 = scalar_select %p2151_p11, 1, 0 }
  0x2e   : > { %p2156_p13 = por %p324_p9, %p295_p5  ;;  %p2160_p2 = pnand %p1257_p10, %p332_p12 }
  0x2f   : > { %2783 = sst [smem:[#allocation41_spill]] %s2782_s29  ;;  %s1985_s27 = smov [#allocation7]  }
  0x30   : > { %s2784_s12 = scalar_select %p2156_p13, 1, 0 }
  0x31   : > { %s2786_s24 = scalar_select %p2160_p2, 1, 0 }
  0x32   : > { %2785 = sst [smem:[#allocation42_spill]] %s2784_s12  ;;  %s345_s28 = sshll.u32 %s1985_s27, 4  ;;  %s346_s28 = int_to_ptr.vmem [resolvable:$true] %s345_s28 }
  0x33   : > { %2787 = sst [smem:[#allocation43_spill]] %s2786_s24  ;;  %p1376_p0 = pneg %p2160_p2 }
  0x34   : > { %s53_s15 = sadd.s32 1, %s1975_s20  ;;  %s2790_s2 = sld [smem:[#allocation51_spill]] }
  0x35   : > { %p2168_p8 = pnand %p1376_p0, %p2722_p1  ;;  %p2173_p5 = scmp.ge.s32.totalorder %s53_s15, 4 }
  0x37   : > { %s2789_s9 = scalar_select %p2173_p5, 1, 0 }
  0x38   : > { %p1545_p10 = pneg %p2168_p8 }
  0x3a   : > { %s1543_s8 = scalar_lea.hbm %s2790_s2, 16 }
  0x3b   : > { %p1544_p9 = scmp.ne.s32.totalorder %s2790_s2, %s1543_s8  ;;  %p1550_p1 = scmp.lt.u32.totalorder %s1543_s8, %s2790_s2 }
  0x3d   : > { %p1546_p12 = pnand %p1545_p10, %p1544_p9 }
  0x3f   : > { %p1547_p0 = pneg %p1546_p12 }
  0x41   : > { %p1552_p3 = pnand %p1550_p1, %p1547_p0 }
  0x43   : > { %1555 = shalt.err (!%p1552_p3)
}
  0x44   : > { %s1556_s26 = scalar_lea.vmem %s346_s28, 16  ;;  %s1563_s29 = scalar_lea.vmem %s346_s28, 32 }
  0x45   : > { %p1557_p13 = scmp.ne.s32.totalorder %s346_s28, %s1556_s26  ;;  %p1564_p6 = scmp.lt.s32.totalorder %s346_s28, %s346_s28 }
  0x46   : > { %p1565_p4 = scmp.lt.s32.totalorder %s1563_s29, %s1556_s26 }
  0x47   : > { %p1559_p7 = pnand %p1557_p13, %p1545_p10 }
  0x48   : > { %p1566_p2 = por %p1565_p4, %p1564_p6 }
  0x49   : > { %p1560_p11 = pneg %p1559_p7 }
  0x4b   : > { %p1567_p5 = pnand %p1566_p2, %p1560_p11 }
  0x4d   : > { %1570 = shalt.err (!%p1567_p5)
}
  0x4e   : > { %1379 = dma.hbm_to_vmem [thread:$0]  (!%p2168_p8), %s2790_s2, 16, %s346_s28, [#allocation6]  }
  0x4f   : > { %p2791_p1 = scmp.ne.s32.totalorder %s2789_s9, 0  ;;  %p2736_p3 = scmp.eq.s32.totalorder %s1983_s22, 0 }
  0x50   : > { %p151_p4 = scmp.ne.s32.totalorder %s1951_s14, %s1947_s13  ;;  %p2735_p6 = scmp.lt.s32.totalorder %s1983_s22, 8 }
  0x51   : > { %s2877_s15 = smov (%p2791_p1, %s53_s15), 0  ;;  %s2203_s30 = sand.u32 1, %s1983_s22  }
  0x52   : > { %2792 = sst [smem:[#allocation44_spill]] %s2877_s15  ;;  %s2206_s10 = sand.u32 1, %s1951_s14  }
  0x53   : > { %p153_p7 = por %p151_p4, %p2736_p3  ;;  %s1264_s18 = sshll.u32 %s2206_s10, 3 }
  0x54   : > { %s1265_s26 = sshll.u32 %s1975_s20, 7  ;;  %s2793_s3 = sld [smem:[#allocation52_spill]] }
  0x55   : > { %s397_s19 = scalar_lea.vmem [#allocation8], %s1264_s18  ;;  %p2219_p11 = pnand %p2735_p6, %p153_p7 }
  0x56   : > { %s405_s12 = sshll.u32 %s397_s19, 4  ;;  %s2738_s13 = scalar_lea.sflag [#allocation9], %s2203_s30  ;;  %s2223_s12 = int_to_ptr.vmem [resolvable:$true] %s405_s12 }
  0x57   : > { %s2794_s8 = scalar_select %p2219_p11, 1, 0 }
  0x58   : > { %p2231_p2 = pneg %p2219_p11 }
  0x59   : > { %2795 = sst [smem:[#allocation45_spill]] %s2794_s8 }
  0x5a   : > { %s2215_s29 = scalar_lea.hbm %s2793_s3, %s1265_s26  ;;  %s1576_s28 = scalar_lea.hbm %s2793_s3, 512 }
  0x5b   : > { %s1571_s25 = scalar_lea.hbm %s2215_s29, 128  ;;  %p1577_p9 = scmp.lt.u32.totalorder %s2215_s29, %s2793_s3 }
  0x5c   : > { %p1572_p13 = scmp.ne.s32.totalorder %s2215_s29, %s1571_s25  ;;  %p1578_p10 = scmp.lt.u32.totalorder %s1576_s28, %s1571_s25 }
  0x5d   : > { %s2796_s26 = scalar_select %p2231_p2, 1, 0 }
  0x5e   : > { %p1574_p8 = pnand %p2231_p2, %p1572_p13  ;;  %p1579_p12 = por %p1578_p10, %p1577_p9 }
  0x5f   : > { %p1580_p0 = scmp.lt.u32.totalorder %s1571_s25, %s2215_s29 }
  0x60   : > { %p1575_p5 = pneg %p1574_p8 }
  0x61   : > { %p1581_p4 = por %p1580_p0, %p1579_p12 }
  0x63   : > { %p1582_p7 = pnand %p1581_p4, %p1575_p5 }
  0x65   : > { %1585 = shalt.err (!%p1582_p7)
}
  0x66   : > { %s1586_s2 = scalar_lea.vmem %s2223_s12, 128  ;;  %s1986_s18 = smov [#allocation8]  }
  0x67   : > { %p1587_p13 = scmp.ne.s32.totalorder %s2223_s12, %s1586_s2  ;;  %s1591_s27 = sshll.u32 %s1986_s18, 4  ;;  %s1592_s27 = int_to_ptr.vmem [resolvable:$false] %s1591_s27 }
  0x68   : > { %s1593_s24 = scalar_lea.vmem %s1592_s27, 256  ;;  %p1594_p3 = scmp.lt.s32.totalorder %s2223_s12, %s1592_s27 }
  0x69   : > { %p1589_p8 = pnand %p1587_p13, %p2231_p2  ;;  %p1595_p1 = scmp.lt.s32.totalorder %s1593_s24, %s1586_s2 }
  0x6b   : > { %p1590_p6 = pneg %p1589_p8  ;;  %p1596_p9 = por %p1595_p1, %p1594_p3 }
  0x6d   : > { %p1597_p10 = pnand %p1596_p9, %p1590_p6 }
  0x6f   : > { %1600 = shalt.err (!%p1597_p10)
}
  0x70   : > { %1389 = dma.hbm_to_vmem [thread:$0]  (!%p2219_p11), %s2215_s29, 128, %s2223_s12, %s2738_s13  }
  0x71   : > { %s1306_s25 = sshll.u32 %s1975_s20, 8  ;;  %s2797_s5 = sld [smem:[#allocation53_spill]] }
  0x72   : > { %s2798_s18 = sshll.u32 %s2206_s10, 4  ;;  %s2741_s3 = scalar_lea.sflag [#allocation12], %s2203_s30 }
  0x73   : > { %s435_s27 = scalar_lea.vmem [#allocation11], %s2798_s18 }
  0x74   : > { %s442_s24 = sshll.u32 %s435_s27, 4  ;;  %s2266_s24 = int_to_ptr.vmem [resolvable:$true] %s442_s24 }
  0x77   : > { %s2262_s2 = scalar_lea.hbm %s2797_s5, %s1306_s25  ;;  %s1606_s28 = scalar_lea.hbm %s2797_s5, 1024 }
  0x78   : > { %s1601_s7 = scalar_lea.hbm %s2262_s2, 256  ;;  %p1607_p5 = scmp.lt.u32.totalorder %s2262_s2, %s2797_s5 }
  0x79   : > { %p1602_p1 = scmp.ne.s32.totalorder %s2262_s2, %s1601_s7  ;;  %p1608_p12 = scmp.lt.u32.totalorder %s1606_s28, %s1601_s7 }
  0x7a   : > { %p1610_p4 = scmp.lt.u32.totalorder %s1601_s7, %s2262_s2 }
  0x7b   : > { %p1604_p3 = pnand %p1602_p1, %p2231_p2  ;;  %p1609_p0 = por %p1608_p12, %p1607_p5 }
  0x7d   : > { %p1605_p6 = pneg %p1604_p3  ;;  %p1611_p7 = por %p1610_p4, %p1609_p0 }
  0x7f   : > { %p1612_p13 = pnand %p1611_p7, %p1605_p6 }
  0x81   : > { %1615 = shalt.err (!%p1612_p13)
}
  0x82   : > { %s1616_s18 = scalar_lea.vmem %s2266_s24, 256  ;;  %s1987_s27 = smov [#allocation11]  }
  0x83   : > { %p1617_p8 = scmp.ne.s32.totalorder %s2266_s24, %s1616_s18  ;;  %s1621_s29 = sshll.u32 %s1987_s27, 4  ;;  %s1622_s29 = int_to_ptr.vmem [resolvable:$false] %s1621_s29 }
  0x84   : > { %s1623_s13 = scalar_lea.vmem %s1622_s29, 512  ;;  %p1624_p1 = scmp.lt.s32.totalorder %s2266_s24, %s1622_s29 }
  0x85   : > { %p1619_p9 = pnand %p1617_p8, %p2231_p2  ;;  %p1625_p3 = scmp.lt.s32.totalorder %s1623_s13, %s1616_s18 }
  0x87   : > { %p1620_p10 = pneg %p1619_p9  ;;  %p1626_p5 = por %p1625_p3, %p1624_p1 }
  0x89   : > { %p1627_p12 = pnand %p1626_p5, %p1620_p10 }
  0x8b   : > { %1630 = shalt.err (!%p1627_p12)
}
  0x8c   : > { %s2742_s7 = smov 64   ;;  %s2743_s12 = smov 4  }
  0x8d   : > { %1395 = dma.hbm_to_vmem [thread:$0]  (!%p2219_p11), %s2262_s2, 256, %s2266_s24, %s2741_s3, %s2742_s7, %s2742_s7, %s2743_s12  }
  0x8e   : > { %s2300_s18 = scalar_lea.hbm %s2707_s6, %s1306_s25  ;;  %s2799_s27 = sshll.u32 %s2206_s10, 4 }
  0x8f   : > { %s456_s29 = scalar_lea.vmem [#allocation13], %s2799_s27  ;;  %s69_s5 = sadd.s32 1, %s1963_s17 }
  0x90   : > { %s463_s13 = sshll.u32 %s456_s29, 4  ;;  %s60_s8 = sadd.s32 1, %s1979_s21  ;;  %s2304_s13 = int_to_ptr.vmem [resolvable:$true] %s463_s13 }
  0x91   : > { %p76_p6 = scmp.ne.s32.totalorder %s1963_s17, %s1959_s16  ;;  %p2800_p0 = scmp.ne.s32.totalorder %s2789_s9, 0 }
  0x92   : > { %p2801_p4 = scmp.eq.s32.totalorder %s1983_s22, 0  ;;  %s139_s25 = ssub.s32 %s1975_s20, %s2877_s15 }
  0x93   : > { %s2879_s8 = smov (!%p2800_p0, %s60_s8), %s1979_s21  ;;  %p142_p8 = scmp.eq.s32.totalorder %s139_s25, 0 }
  0x94   : > { %p2315_p7 = por %p2801_p4, %p76_p6  ;;  %p62_p13 = scmp.ge.s32.totalorder %s2879_s8, 2 }
  0x95   : > { %p2803_p9 = scmp.eq.s32.totalorder %s2119_s23, 7  ;;  %s356_s9 = sand.u32 1, %s1963_s17  }
  0x96   : > { %s2881_s8 = smov (%p62_p13, %s2879_s8), 0  ;;  %s2807_s28 = sadd.s32 1, %s1951_s14 }
  0x97   : > { %p2323_p10 = por %p2803_p9, %p76_p6  ;;  %2806 = sst [smem:[#allocation47_spill]] %s2881_s8 }
  0x98   : > { %s2333_s19 = scalar_select %p142_p8, %s1951_s14, %s2807_s28  }
  0x99   : > { %s2804_s24 = scalar_select %p2323_p10, 1, 0 }
  0x9a   : > { %2808 = sst [smem:[#allocation48_spill]] %s2333_s19  ;;  %s64_s27 = ssub.s32 %s1979_s21, %s2881_s8 }
  0x9b   : > { %2805 = sst [smem:[#allocation46_spill]] %s2804_s24  ;;  %p67_p1 = scmp.eq.s32.totalorder %s64_s27, 0 }
  0x9c   : > { %s303_s29 = sor.u32 %s139_s25, %s64_s27  ;;  %s2337_s3 = sshll.u32 %s356_s9, 3 }
  0x9d   : > { %p306_p3 = scmp.eq.s32.totalorder %s303_s29, 0  ;;  %s2810_s12 = sadd.s32 1, %s1939_s11 }
  0x9e   : > { %s2340_s7 = scalar_select %p67_p1, %s1963_s17, %s69_s5  }
  0x9f   : > { %s2345_s15 = scalar_select %p306_p3, %s1939_s11, %s2810_s12  }
  0xa0   : > { %2809 = sst [smem:[#allocation49_spill]] %s2340_s7  ;;  %s2348_s24 = sshll.u32 %s1979_s21, 7 }
  0xa1   : > { %s2811_s0 = sld [smem:[#allocation50_spill]]  ;;  %s360_s25 = scalar_lea.vmem [#allocation2], %s2337_s3 }
  0xa2   : > { %s368_s27 = sshll.u32 %s360_s25, 4  ;;  %p2812_p5 = scmp.lt.s32.totalorder %s1983_s22, 8  ;;  %s2357_s27 = int_to_ptr.vmem [resolvable:$true] %s368_s27 }
  0xa3   : > { %s2371_s16 = scalar_lea.hbm %s2702_s1, %s2348_s24  ;;  %s357_s23 = scalar_lea.sflag [#allocation3], %s356_s9 }
  0xa4   : > { %p2363_p12 = pnand %p2812_p5, %p2315_p7 }
  0xa6   : > { %s2813_s5 = scalar_select %p2363_p12, 1, 0 }
  0xa7   : > { %s2354_s28 = scalar_lea.hbm %s2811_s0, %s2348_s24  ;;  %p2377_p0 = pneg %p2363_p12 }
  0xa8   : > { %s1631_s8 = scalar_lea.hbm %s2354_s28, 128  ;;  %s1636_s7 = scalar_lea.hbm %s2811_s0, 256 }
  0xa9   : > { %p1632_p6 = scmp.ne.s32.totalorder %s2354_s28, %s1631_s8  ;;  %p1637_p13 = scmp.lt.u32.totalorder %s2354_s28, %s2811_s0 }
  0xaa   : > { %p1638_p8 = scmp.lt.u32.totalorder %s1636_s7, %s1631_s8  ;;  %p1640_p1 = scmp.lt.u32.totalorder %s1631_s8, %s2354_s28 }
  0xab   : > { %p1634_p4 = pnand %p2377_p0, %p1632_p6 }
  0xac   : > { %p1639_p9 = por %p1638_p8, %p1637_p13 }
  0xad   : > { %p1635_p7 = pneg %p1634_p4 }
  0xae   : > { %p1641_p3 = por %p1640_p1, %p1639_p9 }
  0xb0   : > { %p1642_p5 = pnand %p1641_p3, %p1635_p7 }
  0xb2   : > { %1645 = shalt.err (!%p1642_p5)
}
  0xb3   : > { %s1646_s9 = scalar_lea.vmem %s2357_s27, 128  ;;  %s1990_s21 = smov [#allocation2]  }
  0xb4   : > { %p1647_p6 = scmp.ne.s32.totalorder %s2357_s27, %s1646_s9  ;;  %s1651_s2 = sshll.u32 %s1990_s21, 4  ;;  %s1652_s2 = int_to_ptr.vmem [resolvable:$false] %s1651_s2 }
  0xb5   : > { %s1653_s12 = scalar_lea.vmem %s1652_s2, 256  ;;  %p1654_p11 = scmp.lt.s32.totalorder %s2357_s27, %s1652_s2 }
  0xb6   : > { %p1649_p4 = pnand %p1647_p6, %p2377_p0  ;;  %p1655_p2 = scmp.lt.s32.totalorder %s1653_s12, %s1646_s9 }
  0xb8   : > { %p1650_p10 = pneg %p1649_p4  ;;  %p1656_p13 = por %p1655_p2, %p1654_p11 }
  0xba   : > { %p1657_p8 = pnand %p1656_p13, %p1650_p10 }
  0xbc   : > { %1660 = shalt.err (!%p1657_p8)
}
  0xbd   : > { %1383 = dma.hbm_to_vmem [thread:$0]  (!%p2363_p12), %s2354_s28, 128, %s2357_s27, %s357_s23  }
  0xbe   : > { %s379_s8 = scalar_lea.vmem [#allocation5], %s2337_s3  ;;  %s2407_s21 = scalar_lea.hbm %s2705_s4, %s2348_s24 }
  0xbf   : > { %s386_s7 = sshll.u32 %s379_s8, 4  ;;  %s376_s2 = scalar_lea.sflag [#allocation6], %s2203_s30  ;;  %s2401_s7 = int_to_ptr.vmem [resolvable:$true] %s386_s7 }
  0xc0   : > { %s1661_s12 = scalar_lea.hbm %s2371_s16, 128  ;;  %s1666_s19 = scalar_lea.hbm %s2702_s1, 256 }
  0xc1   : > { %p1662_p11 = scmp.ne.s32.totalorder %s2371_s16, %s1661_s12  ;;  %p1667_p7 = scmp.lt.u32.totalorder %s2371_s16, %s2702_s1 }
  0xc2   : > { %p1668_p9 = scmp.lt.u32.totalorder %s1666_s19, %s1661_s12  ;;  %p1670_p3 = scmp.lt.u32.totalorder %s1661_s12, %s2371_s16 }
  0xc3   : > { %p1664_p2 = pnand %p1662_p11, %p2377_p0 }
  0xc4   : > { %p1669_p1 = por %p1668_p9, %p1667_p7 }
  0xc5   : > { %p1665_p10 = pneg %p1664_p2 }
  0xc6   : > { %p1671_p5 = por %p1670_p3, %p1669_p1 }
  0xc8   : > { %p1672_p6 = pnand %p1671_p5, %p1665_p10 }
  0xca   : > { %1675 = shalt.err (!%p1672_p6)
}
  0xcb   : > { %s1676_s24 = scalar_lea.vmem %s2401_s7, 128  ;;  %s1991_s0 = smov [#allocation5]  }
  0xcc   : > { %p1677_p4 = scmp.ne.s32.totalorder %s2401_s7, %s1676_s24  ;;  %s1681_s17 = sshll.u32 %s1991_s0, 4  ;;  %s1682_s17 = int_to_ptr.vmem [resolvable:$false] %s1681_s17 }
  0xcd   : > { %s1683_s23 = scalar_lea.vmem %s1682_s17, 256  ;;  %p1684_p11 = scmp.lt.s32.totalorder %s2401_s7, %s1682_s17 }
  0xce   : > { %p1679_p13 = pnand %p1677_p4, %p2377_p0  ;;  %p1685_p2 = scmp.lt.s32.totalorder %s1683_s23, %s1676_s24 }
  0xd0   : > { %p1680_p8 = pneg %p1679_p13  ;;  %p1686_p7 = por %p1685_p2, %p1684_p11 }
  0xd2   : > { %p1687_p9 = pnand %p1686_p7, %p1680_p8 }
  0xd4   : > { %1690 = shalt.err (!%p1687_p9)
}
  0xd5   : > { %1386 = dma.hbm_to_vmem [thread:$0]  (!%p2363_p12), %s2371_s16, 128, %s2401_s7, %s376_s2  }
  0xd6   : > { %s416_s19 = scalar_lea.vmem [#allocation10], %s2337_s3  ;;  %s1274_s29 = sshll.u32 %s2206_s10, 2 }
  0xd7   : > { %s424_s8 = sshll.u32 %s416_s19, 4  ;;  %s1691_s9 = scalar_lea.hbm %s2407_s21, 128  ;;  %s425_s8 = int_to_ptr.vmem [resolvable:$true] %s424_s8 }
  0xd8   : > { %p1692_p10 = scmp.ne.s32.totalorder %s2407_s21, %s1691_s9  ;;  %s1696_s27 = scalar_lea.hbm %s2705_s4, 256 }
  0xd9   : > { %p1697_p5 = scmp.lt.u32.totalorder %s2407_s21, %s2705_s4  ;;  %p1698_p6 = scmp.lt.u32.totalorder %s1696_s27, %s1691_s9 }
  0xda   : > { %p1694_p1 = pnand %p1692_p10, %p2377_p0  ;;  %p1700_p13 = scmp.lt.u32.totalorder %s1691_s9, %s2407_s21 }
  0xdb   : > { %p1699_p4 = por %p1698_p6, %p1697_p5 }
  0xdc   : > { %p1695_p3 = pneg %p1694_p1 }
  0xdd   : > { %p1701_p8 = por %p1700_p13, %p1699_p4 }
  0xdf   : > { %p1702_p11 = pnand %p1701_p8, %p1695_p3 }
  0xe1   : > { %1705 = shalt.err (!%p1702_p11)
}
  0xe2   : > { %s1706_s3 = scalar_lea.vmem %s425_s8, 128  ;;  %s1992_s16 = smov [#allocation10]  }
  0xe3   : > { %p1707_p2 = scmp.ne.s32.totalorder %s425_s8, %s1706_s3  ;;  %s1711_s7 = sshll.u32 %s1992_s16, 4  ;;  %s1712_s7 = int_to_ptr.vmem [resolvable:$false] %s1711_s7 }
  0xe4   : > { %s1713_s2 = scalar_lea.vmem %s1712_s7, 256  ;;  %p1714_p10 = scmp.lt.s32.totalorder %s425_s8, %s1712_s7 }
  0xe5   : > { %p1709_p7 = pnand %p1707_p2, %p2377_p0  ;;  %p1715_p1 = scmp.lt.s32.totalorder %s1713_s2, %s1706_s3 }
  0xe7   : > { %p1710_p9 = pneg %p1709_p7  ;;  %p1716_p12 = por %p1715_p1, %p1714_p10 }
  0xe9   : > { %p1717_p5 = pnand %p1716_p12, %p1710_p9 }
  0xeb   : > { %1720 = shalt.err (!%p1717_p5)
}
  0xec   : > { %p2815_p6 = scmp.ne.s32.totalorder %s2813_s5, 0  ;;  %s2816_s17 = scalar_lea.sflag [#allocation9], %s2203_s30 }
  0xed   : > { %s1721_s25 = scalar_lea.hbm %s2300_s18, 256  ;;  %p2817_p3 = scmp.ne.s32.totalorder %s2796_s26, 0 }
  0xee   : > { %1392 = dma.hbm_to_vmem [thread:$0]  (!%p2815_p6), %s2407_s21, 128, %s425_s8, %s2816_s17  }
  0xef   : > { %p1722_p0 = scmp.ne.s32.totalorder %s2300_s18, %s1721_s25  ;;  %s1726_s9 = scalar_lea.hbm %s2707_s6, 1024 }
  0xf0   : > { %p1727_p12 = scmp.lt.u32.totalorder %s2300_s18, %s2707_s6  ;;  %p1728_p8 = scmp.lt.u32.totalorder %s1726_s9, %s1721_s25 }
  0xf1   : > { %p1724_p4 = pnand %p1722_p0, %p2817_p3  ;;  %p1730_p2 = scmp.lt.u32.totalorder %s1721_s25, %s2300_s18 }
  0xf2   : > { %p1729_p11 = por %p1728_p8, %p1727_p12 }
  0xf3   : > { %p1725_p13 = pneg %p1724_p4 }
  0xf4   : > { %p1731_p7 = por %p1730_p2, %p1729_p11 }
  0xf6   : > { %p1732_p9 = pnand %p1731_p7, %p1725_p13 }
  0xf8   : > { %1735 = shalt.err (!%p1732_p9)
}
  0xf9   : > { %s1736_s21 = scalar_lea.vmem %s2304_s13, 256  ;;  %s1993_s8 = smov [#allocation13]  }
  0xfa   : > { %p1737_p10 = scmp.ne.s32.totalorder %s2304_s13, %s1736_s21  ;;  %s1741_s28 = sshll.u32 %s1993_s8, 4  ;;  %s1742_s28 = int_to_ptr.vmem [resolvable:$false] %s1741_s28 }
  0xfb   : > { %s1743_s27 = scalar_lea.vmem %s1742_s28, 512  ;;  %p1744_p6 = scmp.lt.s32.totalorder %s2304_s13, %s1742_s28 }
  0xfc   : > { %p1739_p1 = pnand %p1737_p10, %p2817_p3  ;;  %p1745_p0 = scmp.lt.s32.totalorder %s1743_s27, %s1736_s21 }
  0xfe   : > { %p1740_p5 = pneg %p1739_p1  ;;  %p1746_p4 = por %p1745_p0, %p1744_p6 }
 0x100   : > { %p1747_p12 = pnand %p1746_p4, %p1740_p5 }
 0x102   : > { %1750 = shalt.err (!%p1747_p12)
}
 0x103   : > { %s2818_s24 = sld [smem:[#allocation45_spill]]  ;;  %s2820_s0 = smov 4  }
 0x104   : > { %s2821_s3 = smov 64   ;;  %s2822_s16 = scalar_lea.sflag [#allocation12], %s2203_s30 }
 0x105   : > { %s1275_s7 = sshll.u32 %s1975_s20, 6  ;;  %s2823_s25 = sld [smem:[#allocation54_spill]] }
 0x106   : > { %s477_s19 = scalar_lea.vmem [#allocation14], %s1274_s29  ;;  %s474_s9 = scalar_lea.sflag [#allocation15], %s2206_s10 }
 0x107   : > { %s484_s30 = sshll.u32 %s477_s19, 4  ;;  %s485_s30 = int_to_ptr.vmem [resolvable:$true] %s484_s30 }
 0x109   : > { %p2819_p13 = scmp.ne.s32.totalorder %s2818_s24, 0 }
 0x10b   : > { %1398 = dma.hbm_to_vmem [thread:$0]  (!%p2819_p13), %s2300_s18, 256, %s2304_s13, %s2822_s16, %s2821_s3, %s2821_s3, %s2820_s0  }
 0x10c   : > { %s2482_s23 = scalar_lea.hbm %s2823_s25, %s1275_s7  ;;  %s1756_s5 = scalar_lea.hbm %s2823_s25, 256 }
 0x10d   : > { %s1751_s12 = scalar_lea.hbm %s2482_s23, 64  ;;  %p1757_p7 = scmp.lt.u32.totalorder %s2482_s23, %s2823_s25 }
 0x10e   : > { %p1752_p8 = scmp.ne.s32.totalorder %s2482_s23, %s1751_s12  ;;  %p1758_p9 = scmp.lt.u32.totalorder %s1756_s5, %s1751_s12 }
 0x10f   : > { %p1760_p1 = scmp.lt.u32.totalorder %s1751_s12, %s2482_s23 }
 0x110   : > { %p1754_p11 = pnand %p1752_p8, %p2817_p3  ;;  %p1759_p10 = por %p1758_p9, %p1757_p7 }
 0x112   : > { %p1755_p2 = pneg %p1754_p11  ;;  %p1761_p5 = por %p1760_p1, %p1759_p10 }
 0x114   : > { %p1762_p6 = pnand %p1761_p5, %p1755_p2 }
 0x116   : > { %1765 = shalt.err (!%p1762_p6)
}
 0x117   : > { %s1766_s10 = scalar_lea.vmem %s485_s30, 64  ;;  %s1994_s29 = smov [#allocation14]  }
 0x118   : > { %p1767_p0 = scmp.ne.s32.totalorder %s485_s30, %s1766_s10  ;;  %s1771_s28 = sshll.u32 %s1994_s29, 4  ;;  %s1772_s28 = int_to_ptr.vmem [resolvable:$false] %s1771_s28 }
 0x119   : > { %s1773_s27 = scalar_lea.vmem %s1772_s28, 128  ;;  %p1774_p8 = scmp.lt.s32.totalorder %s485_s30, %s1772_s28 }
 0x11a   : > { %p1769_p4 = pnand %p1767_p0, %p2817_p3  ;;  %p1775_p11 = scmp.lt.s32.totalorder %s1773_s27, %s1766_s10 }
 0x11c   : > { %p1770_p12 = pneg %p1769_p4  ;;  %p1776_p13 = por %p1775_p11, %p1774_p8 }
 0x11e   : > { %p1777_p7 = pnand %p1776_p13, %p1770_p12 }
 0x120   : > { %1780 = shalt.err (!%p1777_p7)
}
 0x121   : > { %p2824_p9 = scmp.ne.s32.totalorder %s2818_s24, 0  ;;  %s2825_s0 = sld [smem:[#allocation43_spill]] }
 0x123   : > { %1401 = dma.hbm_to_vmem [thread:$0]  (!%p2824_p9), %s2482_s23, 64, %s485_s30, %s474_s9  }
 0x127   : > { %p2826_p2 = scmp.ne.s32.totalorder %s2825_s0, 0 }
 0x128   : > { %s2827_s3 = sld [smem:[#allocation32_spill]] (!%p2826_p2)  ;;  %s2828_s26 = sld [smem:[#allocation38_spill]] (!%p2826_p2) }
 0x129   : > { %493 = sbr.rel (%p2826_p2) target bundleno = 1756 (0x6dc), region = 52 }
 0x12e   : > { %s2507_s16 = sand.u32 (!%p2826_p2), 1, %s2827_s3   ;;  %p2829_p3 = scmp.ne.s32.totalorder (!%p2826_p2), %s2828_s26, 0 }
 0x12f   : > { %s2510_s7 = sshll.u32 (!%p2826_p2), %s2507_s16, 3  ;;  %s496_s2 = scalar_lea.sflag (!%p2826_p2), [#allocation3], %s2507_s16 }
 0x130   : > { %s499_s17 = scalar_lea.vmem [#allocation2], %s2510_s7 }
 0x131   : > { %1894 = dma.done.wait (%p2829_p3), %s496_s2, 128  }
 0x132   : > { %1896 = vsyncadd (%p2829_p3), %s496_s2, 4294967168  ;;  %s2830_s24 = sld [smem:[#allocation37_spill]]  ;;  %s508_s30 = scalar_lea.vmem [#allocation5], %s2510_s7 }
 0x138   : > { %s504_s23 = sand.u32 1, %s2830_s24  }
 0x139   : > { %s505_s19 = scalar_lea.sflag [#allocation6], %s504_s23 }
 0x13a   : > { %1898 = dma.done.wait (%p2829_p3), %s505_s19, 128  }
 0x13b   : > { %1900 = vsyncadd (%p2829_p3), %s505_s19, 4294967168  ;;  %p2831_p13 = scmp.eq.s32.totalorder %s2830_s24, 0 }
 0x13d   : > { %1902 = dma.done.wait (%p2831_p13), [#allocation6], 16   ;;  %p2832_p10 = pmov %p2831_p13 }
 0x13e   : > { %s2833_s9 = sld [smem:[#allocation30_spill]]  ;;  %s2834_s12 = sld [smem:[#allocation39_spill]] }
 0x13f   : > { %1904 = vsyncadd (%p2832_p10), [#allocation6], 4294967280  ;;  %s518_s5 = scalar_lea.sflag [#allocation9], %s504_s23 }
 0x144   : > { %s519_s18 = sand.u32 1, %s2833_s9   ;;  %p2835_p1 = scmp.ne.s32.totalorder %s2834_s12, 0 }
 0x145   : > { %s1280_s13 = sshll.u32 %s519_s18, 3 }
 0x146   : > { %s2529_s21 = scalar_lea.vmem [#allocation8], %s1280_s13 }
 0x147   : > { %1906 = dma.done.wait (%p2835_p1), %s518_s5, 128  }
 0x148   : > { %1908 = vsyncadd (%p2835_p1), %s518_s5, 4294967168  ;;  %s530_s8 = scalar_lea.vmem [#allocation10], %s2510_s7 }
 0x149   : > { %1910 = dma.done.wait (%p2829_p3), %s518_s5, 128  }
 0x14a   : > { %1912 = vsyncadd (%p2829_p3), %s518_s5, 4294967168  ;;  %s1282_s10 = sshll.u32 %s519_s18, 4  ;;  %s536_s29 = scalar_lea.sflag [#allocation12], %s504_s23 }
 0x14b   : > { %s2540_s28 = scalar_lea.vmem [#allocation11], %s1282_s10 }
 0x14c   : > { %1914 = dma.done.wait (%p2835_p1), %s536_s29, 512  }
 0x14d   : > { %1916 = vsyncadd (%p2835_p1), %s536_s29, 4294966784  ;;  %s1284_s27 = sshll.u32 %s519_s18, 2  ;;  %s548_s0 = scalar_lea.vmem [#allocation13], %s1282_s10 }
 0x14e   : > { %s554_s3 = scalar_lea.sflag [#allocation15], %s519_s18  ;;  %s2546_s2 = scalar_lea.vmem [#allocation14], %s1284_s27 }
 0x14f   : > { %1918 = dma.done.wait (%p2835_p1), %s554_s3, 64  }
 0x150   : > { %1920 = vsyncadd (%p2835_p1), %s554_s3, 4294967232  ;;  %vm631_vm0 = vcmask 261120   ;;  %v647_v0 = vld [vmem:[%s508_s30] sm:$0xff]  ;;  %v2554_v1 = vld [vmem:[%s499_s17] sm:$0xff]  ;;  %v1995_v8 = vmov 0.0   ;;  %vm1996_vm1 = vmmov 0  }
 0x151   : > { %v648_v2 = vmul.f32 %v647_v0, %v647_v0  ;;  %v630_v3 = vmul.f32 %v2554_v1, %v2554_v1  ;;  %v1531_v6 = vld [vmem:[%s548_s0] sm:$0xff]   ;;  %1328 = vmatprep.subr.bf16.mxu1 %v1995_v8  ;;  %1320 = vmatprep.subr.bf16.mxu0 %v1995_v8  ;;  %v1532_v9 = vld [vmem:[%s548_s0 + $0x8] sm:$0xff]   ;;  %vm780_vm2 = vcmask 64512   ;;  %s1997_s26 = smov 120   ;;  %vm850_vm3 = vcmask 1043456   ;;  %s2836_s17 = sld [smem:[#allocation29_spill]] }
 0x152   : > { %v1533_v7 = vld [vmem:[%s2540_s28] sm:$0xff]   ;;  %1329 = vmatpush3.bf16.msra.mxu1 %v1531_v6  ;;  %1332 = vmatprep.mubr.msk.bf16.mxu1 %vm1996_vm1, %v1995_v8  ;;  %v1534_v10 = vld [vmem:[%s2540_s28 + $0x8] sm:$0xff]   ;;  %s619_s30 = scalar_lea.vmem [#allocation16], %s2510_s7  ;;  %s2837_s9 = sld [smem:[#allocation34_spill]] }
 0x153   : > { %v649_v4 = vsel %vm631_vm0, %v648_v2, 0.0  ;;  %v632_v5 = vsel %vm631_vm0, %v630_v3, 0.0  ;;  %1321 = vmatpush3.bf16.msra.mxu0 %v1533_v7  ;;  %1330 = vmatprep.subr.bf16.mxu1 %v1995_v8  ;;  %v1287_v18 = vld [vmem:[#allocation7] ss:$0 sm:$0xff]  ;;  %v895_v35 = vld [vmem:[%s2546_s2] sm:$0xf] }
 0x154   : > { %650 = vadd.xlane.f32.xlu0 %v649_v4  ;;  %1322 = vmatprep.subr.bf16.mxu0 %v1995_v8  ;;  %v900_v38 = vsel %vm850_vm3, %v895_v35, 0  ;;  %v779_v41 = vld [vmem:[%s530_s8] sm:$0xff]  ;;  %v827_v43 = vld [vmem:[%s2529_s21] sm:$0xff] }
 0x155   : > { %1324 = vmatprep.mubr.msk.bf16.mxu0 %vm1996_vm1, %v1995_v8 }
 0x156   : > { %1331 = vmatpush3.bf16.msra.mxu1 %v1532_v9 }
 0x157   : > { %1342 = vmatprep.subr.bf16.mxu1 %v1995_v8  ;;  %1323 = vmatpush3.bf16.msra.mxu0 %v1534_v10  ;;  %s624_s24 = sand.u32 1, %s2836_s17  }
 0x158   : > { %633 = vadd.xlane.f32.xlu0 %v632_v5  ;;  %1336 = vmatprep.subr.bf16.mxu0 %v1995_v8  ;;  %s2581_s23 = sshll.u32 %s624_s24, 3  ;;  %p1297_p5 = scmp.ne.s32.totalorder %s2837_s9, 0 }
 0x159   : > { %s626_s19 = scalar_lea.vmem [#allocation17], %s2581_s23 }
 0x1e1   : > { %v651_v11 = vpop.xlane.xlu0 %650 }
 0x1e2   : > { %v652_v12 = vmul.f32 0.03125, %v651_v11 }
 0x1e4   : > { %v653_v13 = vadd.f32 1e-06, %v652_v12 }
 0x1e5   : > { %v634_v14 = vpop.xlane.xlu0 %633 }
 0x1e6   : > { %1535 = vrsqrt.f32 %v653_v13  ;;  %v636_v15 = vmul.f32 0.03125, %v634_v14 }
 0x1e8   : > { %v637_v16 = vadd.f32 1e-06, %v636_v15 }
 0x1ea   : > { %1537 = vrsqrt.f32 %v637_v16 }
 0x1f0   : > { %v1536_v17 = vpop.eup %1535 }
 0x1f1   : > { %v655_v19 = vmul.f32 %v1536_v17, %v647_v0 }
 0x1f3   : > { %v656_v20 = vmul.f32 %v1287_v18, %v655_v19 }
 0x1f4   : > { %v1538_v21 = vpop.eup %1537 }
 0x1f5   : > { %v717_v22 = vpack.c.bf16 %v656_v20, %v656_v20  ;;  %v639_v23 = vmul.f32 %v1538_v21, %v2554_v1 }
 0x1f7   : > { %1333 = vmatmul.mubr.msk.bf16.vlgmr.msra.gmra.mrb[0].mxu1 %vm631_vm0, %v717_v22  ;;  %v646_v24 = vmul.f32 %v1287_v18, %v639_v23 }
 0x1f8   : > { %1344 = vmatprep.mubr.msk.bf16.mxu1 %vm1996_vm1, %v1995_v8 }
 0x1f9   : > { %v657_v25 = vpack.c.bf16 %v646_v24, %v646_v24 }
 0x1fb   : > { %1325 = vmatmul.mubr.msk.bf16.vlgmr.msra.gmra.mrb[0].mxu0 %vm631_vm0, %v657_v25 }
 0x1fc   : > { %1338 = vmatprep.mubr.msk.bf16.mxu0 %vm1996_vm1, %v1995_v8 }
 0x2ca   : > { %v771_v26 = vpop.f32.mrb[0].mxu1 }
 0x2cb   : > { %v778_v27 = vpack.c.bf16 %v771_v26, %v771_v26  ;;  %v1334_v28 = vpop.f32.mrb[1].mxu1 }
 0x2cc   : > { %v774_v29 = vpop.f32.mrb[2].mxu1 }
 0x2cd   : > { %v785_v30 = vsel %vm780_vm2, %v778_v27, 0  ;;  %v1335_v31 = vpop.f32.mrb[3].mxu1  ;;  %845 = vrot.lane.b32.xlu0 %v778_v27, %s1997_s26 }
 0x2ce   : > { %1337 = vmatpush3.bf16.xpose.msra.mxu0 %v785_v30  ;;  %v711_v32 = vpop.f32.mrb[0].mxu0 }
 0x2cf   : > { %v1326_v33 = vpop.f32.mrb[1].mxu0  ;;  %1348 = vmatprep.subr.bf16.mxu0 %v1995_v8  ;;  %v777_v36 = vpack.c.bf16 %v711_v32, %v711_v32 }
 0x2d0   : > { %v714_v34 = vpop.f32.mrb[2].mxu0 }
 0x2d1   : > { %v1327_v37 = vpop.f32.mrb[3].mxu0 }
 0x2d5   : > { %1339 = vmatmul.mubr.msk.bf16.vlgmr.msra.gmra.mrb[4].mxu0 %vm780_vm2, %v777_v36 }
 0x2d6   : > { %1349 = vmatpush3.bf16.msra.mxu0 %v900_v38  ;;  %1350 = vmatprep.mubr.msk.bf16.mxu0 %vm1996_vm1, %v1995_v8 }
 0x33f   : > { %v846_v39 = vpop.permute.xlu0 %845 }
 0x340   : > { %v852_v40 = vsel %vm850_vm3, %v846_v39, 0 }
 0x341   : > { %1343 = vmatpush3.bf16.msra.mxu1 %v852_v40 }
 0x3a8   : > { %v821_v42 = vpop.f32.mrb[4].mxu0 }
 0x3a9   : > { %v822_v44 = vadd.f32 %v821_v42, %v779_v41  ;;  %v1340_v45 = vpop.f32.mrb[5].mxu0 }
 0x3aa   : > { %v824_v46 = vpop.f32.mrb[6].mxu0 }
 0x3ab   : > { %v1341_v47 = vpop.f32.mrb[7].mxu0  ;;  %v828_v48 = vadd.f32 %v827_v43, %v822_v44 }
 0x3ad   : > { %v829_v49 = vsel %vm780_vm2, %v828_v48, -inf }
 0x3ae   : > { %830 = vmax.xlane.f32.xlu1 %v829_v49 }
 0x43b   : > { %v831_v50 = vpop.xlane.xlu1 %830 }
 0x43c   : > { %v832_v51 = vsub.f32 %v828_v48, %v831_v50 }
 0x43e   : > { %v833_v52 = vmul.f32 1.442695, %v832_v51 }
 0x440   : > { %1539 = vpow2.f32 %v833_v52 }
 0x44a   : > { %v1540_v53 = vpop.eup %1539 }
 0x44b   : > { %v835_v54 = vsel %vm780_vm2, %v1540_v53, 0.0 }
 0x44c   : > { %836 = vadd.xlane.f32.xlu1 %v835_v54 }
 0x4d9   : > { %v837_v55 = vpop.xlane.xlu1 %836 }
 0x4da   : > { %1541 = vrcp.f32 %v837_v55 }
 0x4e4   : > { %v1542_v56 = vpop.eup %1541 }
 0x4e5   : > { %v839_v57 = vmul.f32 %v1542_v56, %v1540_v53 }
 0x4e7   : > { %840 = vst.msk [vmem:[%s626_s19] sm:$0xff] %vm780_vm2, %v839_v57  ;;  %v843_v58 = vpack.c.bf16 %v839_v57, %v839_v57 }
 0x4e9   : > { %1345 = vmatmul.mubr.msk.bf16.vlgmr.msra.gmra.mrb[4].mxu1 %vm780_vm2, %v843_v58 }
 0x5bc   : > { %v888_v59 = vpop.f32.mrb[4].mxu1 }
 0x5bd   : > { %v894_v60 = vpack.c.bf16 %v888_v59, %v888_v59  ;;  %v1346_v61 = vpop.f32.mrb[5].mxu1 }
 0x5be   : > { %v891_v62 = vpop.f32.mrb[6].mxu1 }
 0x5bf   : > { %v1347_v63 = vpop.f32.mrb[7].mxu1  ;;  %1351 = vmatmul.mubr.msk.bf16.vlgmr.msra.gmra.mrb[8].mxu0 %vm780_vm2, %v894_v60 }
 0x68f   : > { %945 = sbr.rel (%p1297_p5) target bundleno = 1686 (0x696), region = 88 }
 0x692   : > { %v936_v0 = vpop.f32.mrb[8].mxu0 }
 0x693   : > { %v1352_v2 = vpop.f32.mrb[9].mxu0  ;;  %v946_v5 = vadd.f32 (!%p1297_p5), %v936_v0, %v2554_v1 }
 0x694   : > { %v939_v3 = vpop.f32.mrb[10].mxu0 }
 0x695   : > { %v1353_v4 = vpop.f32.mrb[11].mxu0  ;;  %947 = vst.msk [vmem:[%s619_s30] sm:$0xff] (!%p1297_p5), %vm631_vm0, %v946_v5 }
 0x696 PF: > { %s2838_s12 = sld [smem:[#allocation34_spill]] }
 0x69c   : > { %p1298_p6 = scmp.le.s32.totalorder %s2838_s12, 0 }
 0x69d   : > { %v952_v6 = vld [vmem:[%s619_s30] sm:$0xff] (!%p1298_p6) }
 0x69e   : > { %951 = sbr.rel (%p1298_p6) target bundleno = 1701 (0x6a5), region = 92  ;;  %v953_v7 = vadd.f32 (!%p1298_p6), %v952_v6, %v936_v0 }
 0x6a0   : > { %954 = vst.msk [vmem:[%s619_s30] sm:$0xff] (!%p1298_p6), %vm631_vm0, %v953_v7 }
 0x6a5 PF: > { %s2839_s18 = sld [smem:[#allocation35_spill]]  ;;  %s2840_s13 = sld [smem:[#allocation46_spill]] }
 0x6a6   : > { %s2841_s8 = sld [smem:[#allocation55_spill]]  ;;  %s975_s29 = sshll.u32 %s619_s30, 4  ;;  %s976_s29 = int_to_ptr.vmem [resolvable:$true] %s975_s29 }
 0x6a7   : > { %s956_s28 = scalar_lea.sflag [#allocation4], %s2507_s16  ;;  %s1781_s27 = scalar_lea.vmem %s976_s29, 128 }
 0x6a8   : > { %p1782_p0 = scmp.ne.s32.totalorder %s976_s29, %s1781_s27  ;;  %s1998_s0 = smov [#allocation16]  }
 0x6a9   : > { %s1785_s3 = sshll.u32 %s1998_s0, 4  ;;  %s1786_s3 = int_to_ptr.vmem [resolvable:$false] %s1785_s3 }
 0x6aa   : > { %s1787_s2 = scalar_lea.vmem %s1786_s3, 256  ;;  %p1788_p11 = scmp.lt.s32.totalorder %s976_s29, %s1786_s3 }
 0x6ab   : > { %s1301_s7 = sshll.u32 %s2839_s18, 7  ;;  %p2842_p4 = scmp.ne.s32.totalorder %s2840_s13, 0 }
 0x6ac   : > { %s2599_s10 = scalar_lea.hbm %s2841_s8, %s1301_s7  ;;  %p1789_p7 = scmp.lt.s32.totalorder %s1787_s2, %s1781_s27 }
 0x6ad   : > { %p1783_p12 = pnand %p1782_p0, %p2842_p4 }
 0x6ae   : > { %p1790_p9 = por %p1789_p7, %p1788_p11 }
 0x6af   : > { %p1784_p8 = pneg %p1783_p12 }
 0x6b1   : > { %p1791_p2 = pnand %p1790_p9, %p1784_p8 }
 0x6b3   : > { %1794 = shalt.err (!%p1791_p2)
}
 0x6b4   : > { %s1795_s16 = scalar_lea.hbm %s2599_s10, 128  ;;  %s1799_s30 = scalar_lea.hbm %s2841_s8, 256 }
 0x6b5   : > { %p1796_p3 = scmp.ne.s32.totalorder %s2599_s10, %s1795_s16  ;;  %p1800_p1 = scmp.lt.u32.totalorder %s2599_s10, %s2841_s8 }
 0x6b6   : > { %p1801_p5 = scmp.lt.u32.totalorder %s1799_s30, %s1795_s16  ;;  %p1803_p0 = scmp.lt.u32.totalorder %s1795_s16, %s2599_s10 }
 0x6b7   : > { %p1797_p13 = pnand %p1796_p3, %p2842_p4 }
 0x6b8   : > { %p1802_p6 = por %p1801_p5, %p1800_p1 }
 0x6b9   : > { %p1798_p10 = pneg %p1797_p13 }
 0x6ba   : > { %p1804_p12 = por %p1803_p0, %p1802_p6 }
 0x6bc   : > { %p1805_p8 = pnand %p1804_p12, %p1798_p10 }
 0x6be   : > { %1808 = shalt.err (!%p1805_p8)
}
 0x6bf   : > { %s2843_s7 = sld [smem:[#allocation34_spill]]  ;;  %s2845_s21 = sld [smem:[#allocation41_spill]] }
 0x6c0   : > { %1372 = dma.vmem_to_hbm [thread:$0]  (%p2842_p4), %s976_s29, 128, %s2599_s10, %s956_s28  }
 0x6c1   : > { %s1302_s27 = sshll.u32 %s2839_s18, 2  ;;  %s991_s0 = sshll.u32 %s626_s19, 4  ;;  %s2623_s0 = int_to_ptr.vmem [resolvable:$true] %s991_s0 }
 0x6c2   : > { %s2846_s13 = sld [smem:[#allocation56_spill]]  ;;  %s961_s30 = scalar_lea.sflag [#allocation18], %s624_s24 }
 0x6c3   : > { %s1809_s12 = scalar_lea.vmem %s2623_s0, 128  ;;  %s1999_s23 = smov [#allocation17]  }
 0x6c4   : > { %p1810_p11 = scmp.ne.s32.totalorder %s2623_s0, %s1809_s12  ;;  %s1813_s19 = sshll.u32 %s1999_s23, 4  ;;  %s1814_s19 = int_to_ptr.vmem [resolvable:$false] %s1813_s19 }
 0x6c5   : > { %s987_s3 = sadd.s32 %s2843_s7, %s1302_s27  ;;  %p2848_p7 = scmp.ne.s32.totalorder %s2845_s21, 0 }
 0x6c6   : > { %s1303_s2 = sshll.u32 %s987_s3, 7  ;;  %s1815_s18 = scalar_lea.vmem %s1814_s19, 256 }
 0x6c7   : > { %p1811_p4 = pnand %p1810_p11, %p2848_p7  ;;  %p1816_p2 = scmp.lt.s32.totalorder %s2623_s0, %s1814_s19 }
 0x6c8   : > { %s2847_s9 = smov %s2846_s13  ;;  %s989_s17 = scalar_lea.hbm %s2846_s13, %s1303_s2 }
 0x6c9   : > { %p1812_p9 = pneg %p1811_p4  ;;  %p1817_p3 = scmp.lt.s32.totalorder %s1815_s18, %s1809_s12 }
 0x6cb   : > { %p1818_p13 = por %p1817_p3, %p1816_p2 }
 0x6cd   : > { %p1819_p10 = pnand %p1818_p13, %p1812_p9 }
 0x6cf   : > { %1822 = shalt.err (!%p1819_p10)
}
 0x6d0   : > { %s1823_s10 = scalar_lea.hbm %s989_s17, 128  ;;  %s1827_s28 = scalar_lea.hbm %s2847_s9, 1024 }
 0x6d1   : > { %p1824_p1 = scmp.ne.s32.totalorder %s989_s17, %s1823_s10  ;;  %p1828_p0 = scmp.lt.u32.totalorder %s989_s17, %s2847_s9 }
 0x6d2   : > { %p1829_p12 = scmp.lt.u32.totalorder %s1827_s28, %s1823_s10  ;;  %p1831_p11 = scmp.lt.u32.totalorder %s1823_s10, %s989_s17 }
 0x6d3   : > { %p1825_p5 = pnand %p1824_p1, %p2848_p7 }
 0x6d4   : > { %p1830_p8 = por %p1829_p12, %p1828_p0 }
 0x6d5   : > { %p1826_p6 = pneg %p1825_p5 }
 0x6d6   : > { %p1832_p4 = por %p1831_p11, %p1830_p8 }
 0x6d8   : > { %p1833_p9 = pnand %p1832_p4, %p1826_p6 }
 0x6da   : > { %1836 = shalt.err (!%p1833_p9)
}
 0x6db   : > { %1373 = dma.vmem_to_hbm [thread:$0]  (%p2848_p7), %s2623_s0, 128, %s989_s17, %s961_s30  }
 0x6dc PF: > { %s2849_s27 = sld [smem:[#allocation31_spill]]  ;;  %s2850_s3 = sld [smem:[#allocation40_spill]] }
 0x6dd   : > { %p1412_p2 = scmp.ge.s32.totalorder %s1983_s22, 2 }
 0x6e2   : > { %s1003_s2 = sand.u32 1, %s2849_s27   ;;  %p2851_p3 = scmp.ne.s32.totalorder %s2850_s3, 0 }
 0x6e3   : > { %s1004_s16 = scalar_lea.sflag [#allocation4], %s1003_s2 }
 0x6e4   : > { %p1403_p13 = pnand %p1412_p2, %p2851_p3 }
 0x6e6   : > { %1922 = dma.done.wait (!%p1403_p13), %s1004_s16, 128  }
 0x6e7   : > { %1924 = vsyncadd (!%p1403_p13), %s1004_s16, 4294967168  ;;  %s2852_s26 = sld [smem:[#allocation28_spill]]  ;;  %s2853_s13 = sld [smem:[#allocation42_spill]] }
 0x6ed   : > { %s1012_s12 = sand.u32 1, %s2852_s26   ;;  %p2854_p10 = scmp.ne.s32.totalorder %s2853_s13, 0 }
 0x6ee   : > { %s1013_s23 = scalar_lea.sflag [#allocation18], %s1012_s12 }
 0x6ef   : > { %p1406_p1 = pnand %p1412_p2, %p2854_p10 }
 0x6f1   : > { %1926 = dma.done.wait (!%p1406_p1), %s1013_s23, 128  }
 0x6f2   : > { %1928 = vsyncadd (!%p1406_p1), %s1013_s23, 4294967168  ;;  %s41_s22 = sadd.s32 1, %s1983_s22   ;;  %s2856_s30 = sld [smem:[#allocation29_spill]] }
 0x6f3   : > { %p2654_p7 = scmp.ge.s32.totalorder %s41_s22, 10   ;;  %s2857_s12 = sld [smem:[#allocation30_spill]] }
 0x6f4   : > { %s2858_s0 = sld [smem:[#allocation48_spill]]  ;;  %s2859_s17 = sld [smem:[#allocation32_spill]] }
 0x6f5   : > { %s2860_s16 = sld [smem:[#allocation33_spill]]  ;;  %s2861_s19 = sld [smem:[#allocation49_spill]] }
 0x6f6   : > { %s2862_s24 = sld [smem:[#allocation36_spill]]  ;;  %s2863_s29 = sld [smem:[#allocation44_spill]] }
 0x6f7   : > { %s2864_s28 = sld [smem:[#allocation47_spill]]  ;;  %s2866_s10 = smov %s1939_s11 }
 0x6f8   : > { %s2867_s11 = smov %s2345_s15  ;;  %s2868_s13 = smov %s1951_s14 }
 0x6f9   : > { %s2872_s18 = smov %s1975_s20  ;;  %40 = sbr.rel (!%p2654_p7) target bundleno = 28 (0x1c), region = 200 }
 0x6fa   : > { %s2869_s14 = smov %s2858_s0  ;;  %s2870_s15 = smov %s2859_s17 }
 0x6fb   : > { %s2871_s17 = smov %s2861_s19 }
 0x6fc   : > { %s2873_s19 = smov %s2862_s24  ;;  %s2874_s20 = smov %s2863_s29 }
 0x6fd   : > { %s2875_s21 = smov %s2864_s28 }
 0x700   :  { %1018 = vsyncpa [#allocation3], 1 }
 0x701   :  { %1020 = vsyncpa [#allocation3 + $0x1], 1 }
 0x702   :  { %1021 = vsyncpa [#allocation6], 1 }
 0x703   :  { %1023 = vsyncpa [#allocation6 + $0x1], 1 }
 0x704   :  { %1024 = vsyncpa [#allocation9], 1 }
 0x705   :  { %1026 = vsyncpa [#allocation9 + $0x1], 1 }
 0x706   :  { %1027 = vsyncpa [#allocation12], 1 }
 0x707   :  { %1029 = vsyncpa [#allocation12 + $0x1], 1 }
 0x708   :  { %1030 = vsyncpa [#allocation15], 1 }
 0x709   :  { %1032 = vsyncpa [#allocation15 + $0x1], 1 }
 0x70a   :  { %1033 = vsyncpa [#allocation4], 1 }
 0x70b   :  { %1035 = vsyncpa [#allocation4 + $0x1], 1 }
 0x70c   :  { %1036 = vsyncpa [#allocation18], 1 }
 0x70d   :  { %1038 = vsyncpa [#allocation18 + $0x1], 1 }

</bundles_post_ra>
